<compile_context>
chip_gen: v5e
topology: v5e:2x2
jax: 0.10.0
libtpu: 0.0.40
codegen_flags: <defaults>
</compile_context>

<pallas_src>
import functools
import math

import jax
import jax.numpy as jnp
from jax.experimental import pallas as pl
from jax.experimental.pallas import tpu as pltpu


# ----------------------------------------------------------------------------
# tiling helpers
# ----------------------------------------------------------------------------

def _pick_tile(dim, pref, align):
    """Largest tile <= pref that divides dim and is align-aligned, else full dim."""
    if dim <= pref:
        return dim
    t = (pref // align) * align
    while t >= align:
        if dim % t == 0:
            return t
        t -= align
    return dim


# Conservative scoped-VMEM budget: safe on v5e (128 MiB), v6e (128 MiB), v7x (64 MiB).
VMEM_LIMIT = 32 * 1024 * 1024


# ----------------------------------------------------------------------------
# Tiled linear: y = x @ w + b (optional exact-erf GELU epilogue)
# ----------------------------------------------------------------------------

def _linear_kernel(x_ref, w_ref, b_ref, o_ref, acc_ref, *, activation):
    k = pl.program_id(2)

    @pl.when(k == 0)
    def _():
        acc_ref[...] = jnp.zeros_like(acc_ref)

    acc_ref[...] += jnp.dot(x_ref[...], w_ref[...],
                            preferred_element_type=jnp.float32)

    @pl.when(k == pl.num_programs(2) - 1)
    def _():
        y = acc_ref[...] + b_ref[...]
        if activation == "gelu":
            # exact (erf) GELU, as used by BERT; computed on the f32 accumulator
            y = 0.5 * y * (1.0 + jax.lax.erf(y * (1.0 / math.sqrt(2.0))))
        o_ref[...] = y.astype(o_ref.dtype)


def linear(x, w, b, activation=None):
    """x: (M, K); w: (K, N) [stored bf16]; b: (N,) f32 -> (M, N) f32."""
    M, K = x.shape
    N = w.shape[1]
    x = x.astype(jnp.bfloat16)           # bf16 MXU operands, f32 accumulation
    w = w.astype(jnp.bfloat16)
    b = b.astype(jnp.float32).reshape(1, N)

    tm = _pick_tile(M, 512, 8)
    tn = _pick_tile(N, 512, 128)
    tk = _pick_tile(K, 512, 128)
    grid = (M // tm, N // tn, K // tk)

    cost = pl.CostEstimate(
        flops=2 * M * N * K,
        transcendentals=(M * N if activation == "gelu" else 0),
        bytes_accessed=(M * K + K * N) * 2 + (M * N + N) * 4,
    )

    return pl.pallas_call(
        functools.partial(_linear_kernel, activation=activation),
        out_shape=jax.ShapeDtypeStruct((M, N), jnp.float32),
        grid=grid,
        in_specs=[
            pl.BlockSpec((tm, tk), lambda i, j, k: (i, k)),
            pl.BlockSpec((tk, tn), lambda i, j, k: (k, j)),
            pl.BlockSpec((1, tn), lambda i, j, k: (0, j)),
        ],
        out_specs=pl.BlockSpec((tm, tn), lambda i, j, k: (i, j)),
        scratch_shapes=[pltpu.VMEM((tm, tn), jnp.float32)],
        compiler_params=pltpu.CompilerParams(
            dimension_semantics=("parallel", "parallel", "arbitrary"),
            vmem_limit_bytes=VMEM_LIMIT),
        cost_estimate=cost,
    )(x, w, b)


# ----------------------------------------------------------------------------
# Flash-style multi-head attention (online softmax, kv-tiled, per batch & head)
# ----------------------------------------------------------------------------

def _flash_attn_kernel(q_ref, k_ref, v_ref, mask_ref, o_ref,
                       m_sc, l_sc, acc_sc, *, scale):
    kv = pl.program_id(3)

    @pl.when(kv == 0)
    def _():
        m_sc[...] = jnp.full_like(m_sc, -jnp.inf)
        l_sc[...] = jnp.zeros_like(l_sc)
        acc_sc[...] = jnp.zeros_like(acc_sc)

    q = q_ref[0, 0]            # (tq, Dh)  bf16
    k = k_ref[0, 0]            # (tkv, Dh) bf16
    v = v_ref[0, 0]            # (tkv, Dh) bf16
    mask = mask_ref[0]         # (1, tkv)  f32 (1 = attend, 0 = pad)

    s = jax.lax.dot_general(q, k, (((1,), (1,)), ((), ())),
                            preferred_element_type=jnp.float32) * scale
    s = s + (1.0 - mask) * (-1e9)                      # mask padded keys (f32)

    m_prev = m_sc[...]
    m_new = jnp.maximum(m_prev, jnp.max(s, axis=-1, keepdims=True))
    alpha = jnp.exp(m_prev - m_new)
    p = jnp.exp(s - m_new)
    l_sc[...] = alpha * l_sc[...] + jnp.sum(p, axis=-1, keepdims=True)
    acc_sc[...] = alpha * acc_sc[...] + jnp.dot(
        p.astype(v.dtype), v, preferred_element_type=jnp.float32)
    m_sc[...] = m_new

    @pl.when(kv == pl.num_programs(3) - 1)
    def _():
        inv_l = pl.reciprocal(l_sc[...], approx=True)   # EUP, frees VALU slots
        o_ref[0, 0] = (acc_sc[...] * inv_l).astype(o_ref.dtype)


def attention(q, k, v, mask_f):
    """q,k,v: (B, nH, S, Dh); mask_f: (B, 1, S) f32 -> (B, nH, S, Dh) f32."""
    B, nh, S, Dh = q.shape
    scale = 1.0 / math.sqrt(Dh)
    q = q.astype(jnp.bfloat16)
    k = k.astype(jnp.bfloat16)
    v = v.astype(jnp.bfloat16)

    tq = _pick_tile(S, 256, 8)
    tkv = _pick_tile(S, 256, 128)
    grid = (B, nh, S // tq, S // tkv)

    q_spec = pl.BlockSpec((1, 1, tq, Dh), lambda b, h, qi, ki: (b, h, qi, 0))
    kv_spec = pl.BlockSpec((1, 1, tkv, Dh), lambda b, h, qi, ki: (b, h, ki, 0))
    mask_spec = pl.BlockSpec((1, 1, tkv), lambda b, h, qi, ki: (b, 0, ki))

    return pl.pallas_call(
        functools.partial(_flash_attn_kernel, scale=scale),
        out_shape=jax.ShapeDtypeStruct((B, nh, S, Dh), jnp.float32),
        grid=grid,
        in_specs=[q_spec, kv_spec, kv_spec, mask_spec],
        out_specs=pl.BlockSpec((1, 1, tq, Dh), lambda b, h, qi, ki: (b, h, qi, 0)),
        scratch_shapes=[pltpu.VMEM((tq, 1), jnp.float32),
                        pltpu.VMEM((tq, 1), jnp.float32),
                        pltpu.VMEM((tq, Dh), jnp.float32)],
        compiler_params=pltpu.CompilerParams(
            dimension_semantics=("parallel", "parallel", "parallel", "arbitrary"),
            vmem_limit_bytes=VMEM_LIMIT),
    )(q, k, v, mask_f)


# ----------------------------------------------------------------------------
# Row-tiled LayerNorm (with and without residual add)
# ----------------------------------------------------------------------------

def _ln_kernel(x_ref, g_ref, b_ref, o_ref, *, eps):
    h = x_ref[...].astype(jnp.float32)
    mu = jnp.mean(h, axis=-1, keepdims=True)
    var = jnp.mean((h - mu) ** 2, axis=-1, keepdims=True)
    y = (h - mu) * jax.lax.rsqrt(var + eps)
    o_ref[...] = (y * g_ref[...] + b_ref[...]).astype(o_ref.dtype)


def _add_ln_kernel(x_ref, res_ref, g_ref, b_ref, o_ref, *, eps):
    h = x_ref[...].astype(jnp.float32) + res_ref[...].astype(jnp.float32)
    mu = jnp.mean(h, axis=-1, keepdims=True)
    var = jnp.mean((h - mu) ** 2, axis=-1, keepdims=True)
    y = (h - mu) * jax.lax.rsqrt(var + eps)
    o_ref[...] = (y * g_ref[...] + b_ref[...]).astype(o_ref.dtype)


def layernorm(x, gamma, beta, residual=None, eps=1e-12):
    """LayerNorm(x [+ residual]) over the last (hidden) axis. x: (M, H) f32."""
    M, H = x.shape
    tm = _pick_tile(M, 1024, 8)
    grid = (M // tm,)
    row_spec = pl.BlockSpec((tm, H), lambda i: (i, 0))
    vec_spec = pl.BlockSpec((1, H), lambda i: (0, 0))
    gamma = gamma.reshape(1, H).astype(jnp.float32)
    beta = beta.reshape(1, H).astype(jnp.float32)
    cp = pltpu.CompilerParams(dimension_semantics=("parallel",),
                              vmem_limit_bytes=VMEM_LIMIT)

    if residual is None:
        return pl.pallas_call(
            functools.partial(_ln_kernel, eps=eps),
            out_shape=jax.ShapeDtypeStruct((M, H), jnp.float32),
            grid=grid,
            in_specs=[row_spec, vec_spec, vec_spec],
            out_specs=row_spec,
            compiler_params=cp,
        )(x, gamma, beta)

    return pl.pallas_call(
        functools.partial(_add_ln_kernel, eps=eps),
        out_shape=jax.ShapeDtypeStruct((M, H), jnp.float32),
        grid=grid,
        in_specs=[row_spec, row_spec, vec_spec, vec_spec],
        out_specs=row_spec,
        compiler_params=cp,
    )(x, residual, gamma, beta)


# ----------------------------------------------------------------------------
# Parameter construction (deterministic, synthetic — no checkpoint load)
# ----------------------------------------------------------------------------

def init_params(key, *, vocab_size, max_pos, type_vocab, hidden, num_heads,
                intermediate, num_layers, num_classes):
    keys = iter(jax.random.split(key, 8 + num_layers * 12))
    std = 0.02

    def nrm(shape, dtype=jnp.float32):
        return (jax.random.normal(next(keys), shape, jnp.float32) * std).astype(dtype)

    # classifier head is lane-padded to a multiple of 128 (lane-dense stores)
    n_cls_pad = max(128, ((num_classes + 127) // 128) * 128)
    cls_w = jnp.zeros((hidden, n_cls_pad), jnp.bfloat16)
    cls_w = cls_w.at[:, :num_classes].set(nrm((hidden, num_classes), jnp.bfloat16))

    params = {
        "word_emb": nrm((vocab_size, hidden)),
        "pos_emb": nrm((max_pos, hidden)),
        "type_emb": nrm((type_vocab, hidden)),
        "emb_ln_g": jnp.ones((hidden,), jnp.float32),
        "emb_ln_b": jnp.zeros((hidden,), jnp.float32),
        "cls_w": cls_w,
        "cls_b": jnp.zeros((n_cls_pad,), jnp.float32),
        "layers": [],
    }
    for _ in range(num_layers):
        wq = nrm((hidden, hidden))
        wk = nrm((hidden, hidden))
        wv = nrm((hidden, hidden))
        params["layers"].append({
            # fused QKV projection weight (H, 3H), bf16 MXU operand
            "wqkv": jnp.concatenate([wq, wk, wv], axis=1).astype(jnp.bfloat16),
            "bqkv": jnp.zeros((3 * hidden,), jnp.float32),
            "wo": nrm((hidden, hidden), jnp.bfloat16),
            "bo": jnp.zeros((hidden,), jnp.float32),
            "ln1_g": jnp.ones((hidden,), jnp.float32),
            "ln1_b": jnp.zeros((hidden,), jnp.float32),
            "wi": nrm((hidden, intermediate), jnp.bfloat16),
            "bi": jnp.zeros((intermediate,), jnp.float32),
            "wo2": nrm((intermediate, hidden), jnp.bfloat16),
            "bo2": jnp.zeros((hidden,), jnp.float32),
            "ln2_g": jnp.ones((hidden,), jnp.float32),
            "ln2_b": jnp.zeros((hidden,), jnp.float32),
        })
    return params


# ----------------------------------------------------------------------------
# Forward pass (BertClassifier.forward)
# ----------------------------------------------------------------------------

def bert_classifier_forward(params, input_ids, attention_mask, *,
                            num_heads, num_classes):
    B, S = input_ids.shape
    H = params["word_emb"].shape[1]
    Dh = H // num_heads

    # --- embeddings (gather is glue; LayerNorm is a Pallas kernel, no zero residual) ---
    emb = (jnp.take(params["word_emb"], input_ids, axis=0)
           + params["pos_emb"][:S][None, :, :]
           + params["type_emb"][0][None, None, :])
    x = layernorm(emb.reshape(B * S, H), params["emb_ln_g"], params["emb_ln_b"])
    # embedding / hidden dropout (p=0.1): identity at inference

    mask_f = attention_mask.astype(jnp.float32).reshape(B, 1, S)

    def split_heads(t):
        # head split stays in-XLA glue; Dh is far below 128 lanes at these sizes,
        # so expressing it via BlockSpec slicing would produce misaligned blocks.
        return t.reshape(B, S, num_heads, Dh).transpose(0, 2, 1, 3)

    # --- transformer encoder layers ---
    for layer in params["layers"]:
        # fused QKV projection: one MXU pass over x instead of three
        qkv = linear(x, layer["wqkv"], layer["bqkv"])          # (B*S, 3H)
        q, k, v = (split_heads(qkv[:, i * H:(i + 1) * H].reshape(B, S, H))
                   for i in range(3))

        ctx = attention(q, k, v, mask_f)                       # flash-style, tiled
        ctx = ctx.transpose(0, 2, 1, 3).reshape(B * S, H)

        attn_out = linear(ctx, layer["wo"], layer["bo"])
        x = layernorm(attn_out, layer["ln1_g"], layer["ln1_b"], residual=x)

        inter = linear(x, layer["wi"], layer["bi"], activation="gelu")
        ffn_out = linear(inter, layer["wo2"], layer["bo2"])
        x = layernorm(ffn_out, layer["ln2_g"], layer["ln2_b"], residual=x)

    last_hidden_state = x.reshape(B, S, H)

    # --- BertClassifier head: CLS token, dropout (eval => identity), Linear ---
    pooled_output = last_hidden_state[:, 0, :]                 # (B, H)
    # pad rows to a multiple of 8 sublanes; head weight is already lane-padded to 128
    b_pad = ((B + 7) // 8) * 8
    pooled_pad = jnp.zeros((b_pad, H), pooled_output.dtype).at[:B].set(pooled_output)
    logits_pad = linear(pooled_pad, params["cls_w"], params["cls_b"])
    return logits_pad[:B, :num_classes]


# ----------------------------------------------------------------------------
# Main
# ----------------------------------------------------------------------------

if __name__ == "__main__":
    # small synthetic BERT config
    B, S = 2, 8
    HIDDEN, NUM_HEADS, INTERMEDIATE = 32, 4, 64
    NUM_LAYERS, NUM_CLASSES = 2, 3
    VOCAB, MAX_POS, TYPE_VOCAB = 100, 16, 2

    root = jax.random.PRNGKey(0)
    k_param, k_ids = jax.random.split(root)

    params = init_params(
        k_param, vocab_size=VOCAB, max_pos=MAX_POS, type_vocab=TYPE_VOCAB,
        hidden=HIDDEN, num_heads=NUM_HEADS, intermediate=INTERMEDIATE,
        num_layers=NUM_LAYERS, num_classes=NUM_CLASSES)

    input_ids = jax.random.randint(k_ids, (B, S), 0, VOCAB, dtype=jnp.int32)
    # second sequence has 3 padding tokens at the end
    attention_mask = jnp.array(
        [[1, 1, 1, 1, 1, 1, 1, 1],
         [1, 1, 1, 1, 1, 0, 0, 0]], dtype=jnp.int32)

    fwd = jax.jit(functools.partial(bert_classifier_forward,
                                    num_heads=NUM_HEADS, num_classes=NUM_CLASSES))
    logits = jax.block_until_ready(fwd(params, input_ids, attention_mask))

    assert logits.shape == (B, NUM_CLASSES)
    assert bool(jnp.all(jnp.isfinite(logits)))
    print("KERNEL_OK")
</pallas_src>

<mosaic_0001>
module attributes {stable_mosaic.version = 11 : i64} {
  func.func @_ln_kernel(%arg0: i32, %arg1: memref<16x32xf32, #tpu.memory_space<vmem>>, %arg2: memref<1x32xf32, #tpu.memory_space<vmem>>, %arg3: memref<1x32xf32, #tpu.memory_space<vmem>>, %arg4: memref<16x32xf32, #tpu.memory_space<vmem>>) attributes {dimension_semantics = [#tpu.dimension_semantics<parallel>], iteration_bounds = array<i64: 1>, scalar_prefetch = 0 : i64, scratch_operands = 0 : i64, tpu.core_type = #tpu.core_type<tc>, window_params = [{transform_indices = @transform_0, window_bounds = array<i64: 16, 32>}, {pipeline_mode = #tpu.pipeline_mode<synchronous>, transform_indices = @transform_1, window_bounds = array<i64: 1, 32>}, {pipeline_mode = #tpu.pipeline_mode<synchronous>, transform_indices = @transform_2, window_bounds = array<i64: 1, 32>}, {transform_indices = @transform_3, window_bounds = array<i64: 16, 32>}]} {
    %c0 = arith.constant 0 : index
    %c0_0 = arith.constant 0 : index
    %0 = vector.load %arg1[%c0, %c0_0] : memref<16x32xf32, #tpu.memory_space<vmem>>, vector<16x32xf32>
    %cst = arith.constant dense<0.000000e+00> : vector<16xf32>
    %1 = vector.multi_reduction <add>, %0, %cst [1] : vector<16x32xf32> to vector<16xf32>
    %2 = vector.shape_cast %1 : vector<16xf32> to vector<16x1xf32>
    %cst_1 = arith.constant 3.200000e+01 : f32
    %3 = vector.broadcast %cst_1 : f32 to vector<16x1xf32>
    %4 = arith.divf %2, %3 : vector<16x1xf32>
    %5 = vector.broadcast %4 : vector<16x1xf32> to vector<16x32xf32>
    %6 = arith.subf %0, %5 : vector<16x32xf32>
    %7 = arith.mulf %6, %6 : vector<16x32xf32>
    %cst_2 = arith.constant dense<0.000000e+00> : vector<16xf32>
    %8 = vector.multi_reduction <add>, %7, %cst_2 [1] : vector<16x32xf32> to vector<16xf32>
    %9 = vector.shape_cast %8 : vector<16xf32> to vector<16x1xf32>
    %cst_3 = arith.constant 3.200000e+01 : f32
    %10 = vector.broadcast %cst_3 : f32 to vector<16x1xf32>
    %11 = arith.divf %9, %10 : vector<16x1xf32>
    %12 = vector.broadcast %4 : vector<16x1xf32> to vector<16x32xf32>
    %13 = arith.subf %0, %12 : vector<16x32xf32>
    %cst_4 = arith.constant 9.99999996E-13 : f32
    %14 = vector.broadcast %cst_4 : f32 to vector<16x1xf32>
    %15 = arith.addf %11, %14 : vector<16x1xf32>
    %16 = math.rsqrt %15 : vector<16x1xf32>
    %17 = vector.broadcast %16 : vector<16x1xf32> to vector<16x32xf32>
    %18 = arith.mulf %13, %17 : vector<16x32xf32>
    %c0_5 = arith.constant 0 : index
    %c0_6 = arith.constant 0 : index
    %19 = vector.load %arg2[%c0_5, %c0_6] : memref<1x32xf32, #tpu.memory_space<vmem>>, vector<1x32xf32>
    %20 = vector.broadcast %19 : vector<1x32xf32> to vector<16x32xf32>
    %21 = arith.mulf %18, %20 : vector<16x32xf32>
    %c0_7 = arith.constant 0 : index
    %c0_8 = arith.constant 0 : index
    %22 = vector.load %arg3[%c0_7, %c0_8] : memref<1x32xf32, #tpu.memory_space<vmem>>, vector<1x32xf32>
    %23 = vector.broadcast %22 : vector<1x32xf32> to vector<16x32xf32>
    %24 = arith.addf %21, %23 : vector<16x32xf32>
    %c0_9 = arith.constant 0 : index
    %c0_10 = arith.constant 0 : index
    %25 = vector.load %arg4[%c0_9, %c0_10] : memref<16x32xf32, #tpu.memory_space<vmem>>, vector<16x32xf32>
    tpu.vector_store %arg4[%c0_9, %c0_10], %24 {strides = array<i32>} : memref<16x32xf32, #tpu.memory_space<vmem>>, vector<16x32xf32>,
    return
  }
  func.func @transform_0(%arg0: i32) -> (i32, i32) {
    %c0_i32 = arith.constant 0 : i32
    %c0_i32_0 = arith.constant 0 : i32
    return %arg0, %c0_i32 : i32, i32
  }
  func.func @transform_1(%arg0: i32) -> (i32, i32) {
    %c0_i32 = arith.constant 0 : i32
    %c0_i32_0 = arith.constant 0 : i32
    %c0_i32_1 = arith.constant 0 : i32
    return %c0_i32, %c0_i32_0 : i32, i32
  }
  func.func @transform_2(%arg0: i32) -> (i32, i32) {
    %c0_i32 = arith.constant 0 : i32
    %c0_i32_0 = arith.constant 0 : i32
    %c0_i32_1 = arith.constant 0 : i32
    return %c0_i32, %c0_i32_0 : i32, i32
  }
  func.func @transform_3(%arg0: i32) -> (i32, i32) {
    %c0_i32 = arith.constant 0 : i32
    %c0_i32_0 = arith.constant 0 : i32
    return %arg0, %c0_i32 : i32, i32
  }
}

module attributes {stable_mosaic.version = 11 : i64} {
  func.func @_linear_kernel(%arg0: i32, %arg1: i32, %arg2: i32, %arg3: memref<16x32xbf16, #tpu.memory_space<vmem>>, %arg4: memref<32x96xbf16, #tpu.memory_space<vmem>>, %arg5: memref<1x96xf32, #tpu.memory_space<vmem>>, %arg6: memref<16x96xf32, #tpu.memory_space<vmem>>, %arg7: memref<16x96xf32, #tpu.memory_space<vmem>>) attributes {dimension_semantics = [#tpu.dimension_semantics<parallel>, #tpu.dimension_semantics<parallel>, #tpu.dimension_semantics<arbitrary>], iteration_bounds = array<i64: 1, 1, 1>, scalar_prefetch = 0 : i64, scratch_operands = 1 : i64, tpu.core_type = #tpu.core_type<tc>, window_params = [{transform_indices = @transform_0, window_bounds = array<i64: 16, 32>}, {transform_indices = @transform_1, window_bounds = array<i64: 32, 96>}, {transform_indices = @transform_2, window_bounds = array<i64: 1, 96>}, {transform_indices = @transform_3, window_bounds = array<i64: 16, 96>}]} {
    %c0_i32 = arith.constant 0 : i32
    %0 = arith.cmpi eq, %arg2, %c0_i32 : i32
    %1 = arith.extui %0 : i1 to i32
    %c0_i32_0 = arith.constant 0 : i32
    %2 = arith.cmpi ne, %1, %c0_i32_0 : i32
    scf.if %2 {
      %cst_10 = arith.constant 0.000000e+00 : f32
      %12 = vector.broadcast %cst_10 : f32 to vector<16x96xf32>
      %c0_11 = arith.constant 0 : index
      %c0_12 = arith.constant 0 : index
      %13 = vector.load %arg7[%c0_11, %c0_12] : memref<16x96xf32, #tpu.memory_space<vmem>>, vector<16x96xf32>
      tpu.vector_store %arg7[%c0_11, %c0_12], %12 {strides = array<i32>} : memref<16x96xf32, #tpu.memory_space<vmem>>, vector<16x96xf32>,
    } else {
    }
    %c0 = arith.constant 0 : index
    %c0_1 = arith.constant 0 : index
    %3 = vector.load %arg7[%c0, %c0_1] : memref<16x96xf32, #tpu.memory_space<vmem>>, vector<16x96xf32>
    %c0_2 = arith.constant 0 : index
    %c0_3 = arith.constant 0 : index
    %4 = vector.load %arg3[%c0_2, %c0_3] : memref<16x32xbf16, #tpu.memory_space<vmem>>, vector<16x32xbf16>
    %c0_4 = arith.constant 0 : index
    %c0_5 = arith.constant 0 : index
    %5 = vector.load %arg4[%c0_4, %c0_5] : memref<32x96xbf16, #tpu.memory_space<vmem>>, vector<32x96xbf16>
    %cst = arith.constant dense<0.000000e+00> : vector<16x96xf32>
    %6 = tpu.matmul %4, %5, %cst {dimension_numbers = #tpu.dot_dimension_numbers<[1], [0], [0], [1], [0, 0, 1, 1], [], []>} : vector<16x32xbf16>, vector<32x96xbf16>, vector<16x96xf32> -> vector<16x96xf32>
    %7 = arith.addf %3, %6 : vector<16x96xf32>
    %c0_6 = arith.constant 0 : index
    %c0_7 = arith.constant 0 : index
    %8 = vector.load %arg7[%c0_6, %c0_7] : memref<16x96xf32, #tpu.memory_space<vmem>>, vector<16x96xf32>
    tpu.vector_store %arg7[%c0_6, %c0_7], %7 {strides = array<i32>} : memref<16x96xf32, #tpu.memory_space<vmem>>, vector<16x96xf32>,
    %c0_i32_8 = arith.constant 0 : i32
    %9 = arith.cmpi eq, %arg2, %c0_i32_8 : i32
    %10 = arith.extui %9 : i1 to i32
    %c0_i32_9 = arith.constant 0 : i32
    %11 = arith.cmpi ne, %10, %c0_i32_9 : i32
    scf.if %11 {
      %c0_10 = arith.constant 0 : index
      %c0_11 = arith.constant 0 : index
      %12 = vector.load %arg7[%c0_10, %c0_11] : memref<16x96xf32, #tpu.memory_space<vmem>>, vector<16x96xf32>
      %c0_12 = arith.constant 0 : index
      %c0_13 = arith.constant 0 : index
      %13 = vector.load %arg5[%c0_12, %c0_13] : memref<1x96xf32, #tpu.memory_space<vmem>>, vector<1x96xf32>
      %14 = vector.broadcast %13 : vector<1x96xf32> to vector<16x96xf32>
      %15 = arith.addf %12, %14 : vector<16x96xf32>
      %c0_14 = arith.constant 0 : index
      %c0_15 = arith.constant 0 : index
      %16 = vector.load %arg6[%c0_14, %c0_15] : memref<16x96xf32, #tpu.memory_space<vmem>>, vector<16x96xf32>
      tpu.vector_store %arg6[%c0_14, %c0_15], %15 {strides = array<i32>} : memref<16x96xf32, #tpu.memory_space<vmem>>, vector<16x96xf32>,
    } else {
    }
    return
  }
  func.func @transform_0(%arg0: i32, %arg1: i32, %arg2: i32) -> (i32, i32) {
    %c0_i32 = arith.constant 0 : i32
    return %arg0, %arg2 : i32, i32
  }
  func.func @transform_1(%arg0: i32, %arg1: i32, %arg2: i32) -> (i32, i32) {
    %c0_i32 = arith.constant 0 : i32
    return %arg2, %arg1 : i32, i32
  }
  func.func @transform_2(%arg0: i32, %arg1: i32, %arg2: i32) -> (i32, i32) {
    %c0_i32 = arith.constant 0 : i32
    %c0_i32_0 = arith.constant 0 : i32
    return %c0_i32, %arg1 : i32, i32
  }
  func.func @transform_3(%arg0: i32, %arg1: i32, %arg2: i32) -> (i32, i32) {
    %c0_i32 = arith.constant 0 : i32
    return %arg0, %arg1 : i32, i32
  }
}

module attributes {stable_mosaic.version = 11 : i64} {
  func.func @_flash_attn_kernel(%arg0: i32, %arg1: i32, %arg2: i32, %arg3: i32, %arg4: memref<1x1x8x8xbf16, #tpu.memory_space<vmem>>, %arg5: memref<1x1x8x8xbf16, #tpu.memory_space<vmem>>, %arg6: memref<1x1x8x8xbf16, #tpu.memory_space<vmem>>, %arg7: memref<1x1x8xf32, #tpu.memory_space<vmem>>, %arg8: memref<1x1x8x8xf32, #tpu.memory_space<vmem>>, %arg9: memref<8x1xf32, #tpu.memory_space<vmem>>, %arg10: memref<8x1xf32, #tpu.memory_space<vmem>>, %arg11: memref<8x8xf32, #tpu.memory_space<vmem>>) attributes {dimension_semantics = [#tpu.dimension_semantics<parallel>, #tpu.dimension_semantics<parallel>, #tpu.dimension_semantics<parallel>, #tpu.dimension_semantics<arbitrary>], iteration_bounds = array<i64: 2, 4, 1, 1>, scalar_prefetch = 0 : i64, scratch_operands = 3 : i64, tpu.core_type = #tpu.core_type<tc>, window_params = [{transform_indices = @transform_0, window_bounds = array<i64: 1, 1, 8, 8>}, {transform_indices = @transform_1, window_bounds = array<i64: 1, 1, 8, 8>}, {transform_indices = @transform_2, window_bounds = array<i64: 1, 1, 8, 8>}, {transform_indices = @transform_3, window_bounds = array<i64: 1, 1, 8>}, {transform_indices = @transform_4, window_bounds = array<i64: 1, 1, 8, 8>}]} {
    %c0_i32 = arith.constant 0 : i32
    %0 = arith.cmpi eq, %arg3, %c0_i32 : i32
    %1 = arith.extui %0 : i1 to i32
    %c0_i32_0 = arith.constant 0 : i32
    %2 = arith.cmpi ne, %1, %c0_i32_0 : i32
    scf.if %2 {
      %cst_35 = arith.constant 0xFF800000 : f32
      %46 = vector.broadcast %cst_35 : f32 to vector<8x1xf32>
      %c0_36 = arith.constant 0 : index
      %c0_37 = arith.constant 0 : index
      %47 = vector.load %arg9[%c0_36, %c0_37] : memref<8x1xf32, #tpu.memory_space<vmem>>, vector<8x1xf32>
      tpu.vector_store %arg9[%c0_36, %c0_37], %46 {strides = array<i32>} : memref<8x1xf32, #tpu.memory_space<vmem>>, vector<8x1xf32>,
      %cst_38 = arith.constant 0.000000e+00 : f32
      %48 = vector.broadcast %cst_38 : f32 to vector<8x1xf32>
      %c0_39 = arith.constant 0 : index
      %c0_40 = arith.constant 0 : index
      %49 = vector.load %arg10[%c0_39, %c0_40] : memref<8x1xf32, #tpu.memory_space<vmem>>, vector<8x1xf32>
      tpu.vector_store %arg10[%c0_39, %c0_40], %48 {strides = array<i32>} : memref<8x1xf32, #tpu.memory_space<vmem>>, vector<8x1xf32>,
      %cst_41 = arith.constant 0.000000e+00 : f32
      %50 = vector.broadcast %cst_41 : f32 to vector<8x8xf32>
      %c0_42 = arith.constant 0 : index
      %c0_43 = arith.constant 0 : index
      %51 = vector.load %arg11[%c0_42, %c0_43] : memref<8x8xf32, #tpu.memory_space<vmem>>, vector<8x8xf32>
      tpu.vector_store %arg11[%c0_42, %c0_43], %50 {strides = array<i32>} : memref<8x8xf32, #tpu.memory_space<vmem>>, vector<8x8xf32>,
    } else {
    }
    %c0 = arith.constant 0 : index
    %c0_1 = arith.constant 0 : index
    %c0_2 = arith.constant 0 : index
    %c0_3 = arith.constant 0 : index
    %3 = vector.load %arg4[%c0, %c0_1, %c0_2, %c0_3] : memref<1x1x8x8xbf16, #tpu.memory_space<vmem>>, vector<1x1x8x8xbf16>
    %4 = vector.shape_cast %3 : vector<1x1x8x8xbf16> to vector<8x8xbf16>
    %c0_4 = arith.constant 0 : index
    %c0_5 = arith.constant 0 : index
    %c0_6 = arith.constant 0 : index
    %c0_7 = arith.constant 0 : index
    %5 = vector.load %arg5[%c0_4, %c0_5, %c0_6, %c0_7] : memref<1x1x8x8xbf16, #tpu.memory_space<vmem>>, vector<1x1x8x8xbf16>
    %6 = vector.shape_cast %5 : vector<1x1x8x8xbf16> to vector<8x8xbf16>
    %c0_8 = arith.constant 0 : index
    %c0_9 = arith.constant 0 : index
    %c0_10 = arith.constant 0 : index
    %c0_11 = arith.constant 0 : index
    %7 = vector.load %arg6[%c0_8, %c0_9, %c0_10, %c0_11] : memref<1x1x8x8xbf16, #tpu.memory_space<vmem>>, vector<1x1x8x8xbf16>
    %8 = vector.shape_cast %7 : vector<1x1x8x8xbf16> to vector<8x8xbf16>
    %c0_12 = arith.constant 0 : index
    %c0_13 = arith.constant 0 : index
    %c0_14 = arith.constant 0 : index
    %9 = vector.load %arg7[%c0_12, %c0_13, %c0_14] : memref<1x1x8xf32, #tpu.memory_space<vmem>>, vector<1x1x8xf32>
    %10 = vector.shape_cast %9 : vector<1x1x8xf32> to vector<1x8xf32>
    %cst = arith.constant dense<0.000000e+00> : vector<8x8xf32>
    %11 = tpu.matmul %4, %6, %cst {dimension_numbers = #tpu.dot_dimension_numbers<[1], [1], [0], [0], [0, 0, 1, 0], [], []>} : vector<8x8xbf16>, vector<8x8xbf16>, vector<8x8xf32> -> vector<8x8xf32>
    %cst_15 = arith.constant 0.353553385 : f32
    %12 = vector.broadcast %cst_15 : f32 to vector<8x8xf32>
    %13 = arith.mulf %11, %12 : vector<8x8xf32>
    %cst_16 = arith.constant 1.000000e+00 : f32
    %14 = vector.broadcast %cst_16 : f32 to vector<1x8xf32>
    %15 = arith.subf %14, %10 : vector<1x8xf32>
    %cst_17 = arith.constant -1.000000e+09 : f32
    %16 = vector.broadcast %cst_17 : f32 to vector<1x8xf32>
    %17 = arith.mulf %15, %16 : vector<1x8xf32>
    %18 = vector.broadcast %17 : vector<1x8xf32> to vector<8x8xf32>
    %19 = arith.addf %13, %18 : vector<8x8xf32>
    %c0_18 = arith.constant 0 : index
    %c0_19 = arith.constant 0 : index
    %20 = vector.load %arg9[%c0_18, %c0_19] : memref<8x1xf32, #tpu.memory_space<vmem>>, vector<8x1xf32>
    %cst_20 = arith.constant dense<0xFF800000> : vector<8xf32>
    %21 = vector.multi_reduction <maximumf>, %19, %cst_20 [1] : vector<8x8xf32> to vector<8xf32>
    %22 = vector.shape_cast %21 : vector<8xf32> to vector<8x1xf32>
    %23 = arith.maximumf %20, %22 : vector<8x1xf32>
    %24 = arith.subf %20, %23 : vector<8x1xf32>
    %25 = math.exp %24 : vector<8x1xf32>
    %26 = vector.broadcast %23 : vector<8x1xf32> to vector<8x8xf32>
    %27 = arith.subf %19, %26 : vector<8x8xf32>
    %28 = math.exp %27 : vector<8x8xf32>
    %c0_21 = arith.constant 0 : index
    %c0_22 = arith.constant 0 : index
    %29 = vector.load %arg10[%c0_21, %c0_22] : memref<8x1xf32, #tpu.memory_space<vmem>>, vector<8x1xf32>
    %30 = arith.mulf %25, %29 : vector<8x1xf32>
    %cst_23 = arith.constant dense<0.000000e+00> : vector<8xf32>
    %31 = vector.multi_reduction <add>, %28, %cst_23 [1] : vector<8x8xf32> to vector<8xf32>
    %32 = vector.shape_cast %31 : vector<8xf32> to vector<8x1xf32>
    %33 = arith.addf %30, %32 : vector<8x1xf32>
    %c0_24 = arith.constant 0 : index
    %c0_25 = arith.constant 0 : index
    %34 = vector.load %arg10[%c0_24, %c0_25] : memref<8x1xf32, #tpu.memory_space<vmem>>, vector<8x1xf32>
    tpu.vector_store %arg10[%c0_24, %c0_25], %33 {strides = array<i32>} : memref<8x1xf32, #tpu.memory_space<vmem>>, vector<8x1xf32>,
    %c0_26 = arith.constant 0 : index
    %c0_27 = arith.constant 0 : index
    %35 = vector.load %arg11[%c0_26, %c0_27] : memref<8x8xf32, #tpu.memory_space<vmem>>, vector<8x8xf32>
    %36 = vector.broadcast %25 : vector<8x1xf32> to vector<8x8xf32>
    %37 = arith.mulf %36, %35 : vector<8x8xf32>
    %38 = arith.truncf %28 : vector<8x8xf32> to vector<8x8xbf16>
    %cst_28 = arith.constant dense<0.000000e+00> : vector<8x8xf32>
    %39 = tpu.matmul %38, %8, %cst_28 {dimension_numbers = #tpu.dot_dimension_numbers<[1], [0], [0], [1], [0, 0, 1, 1], [], []>} : vector<8x8xbf16>, vector<8x8xbf16>, vector<8x8xf32> -> vector<8x8xf32>
    %40 = arith.addf %37, %39 : vector<8x8xf32>
    %c0_29 = arith.constant 0 : index
    %c0_30 = arith.constant 0 : index
    %41 = vector.load %arg11[%c0_29, %c0_30] : memref<8x8xf32, #tpu.memory_space<vmem>>, vector<8x8xf32>
    tpu.vector_store %arg11[%c0_29, %c0_30], %40 {strides = array<i32>} : memref<8x8xf32, #tpu.memory_space<vmem>>, vector<8x8xf32>,
    %c0_31 = arith.constant 0 : index
    %c0_32 = arith.constant 0 : index
    %42 = vector.load %arg9[%c0_31, %c0_32] : memref<8x1xf32, #tpu.memory_space<vmem>>, vector<8x1xf32>
    tpu.vector_store %arg9[%c0_31, %c0_32], %23 {strides = array<i32>} : memref<8x1xf32, #tpu.memory_space<vmem>>, vector<8x1xf32>,
    %c0_i32_33 = arith.constant 0 : i32
    %43 = arith.cmpi eq, %arg3, %c0_i32_33 : i32
    %44 = arith.extui %43 : i1 to i32
    %c0_i32_34 = arith.constant 0 : i32
    %45 = arith.cmpi ne, %44, %c0_i32_34 : i32
    scf.if %45 {
      %c0_35 = arith.constant 0 : index
      %c0_36 = arith.constant 0 : index
      %46 = vector.load %arg10[%c0_35, %c0_36] : memref<8x1xf32, #tpu.memory_space<vmem>>, vector<8x1xf32>
      %47 = tpu.reciprocal %46 {approx = true} : vector<8x1xf32> -> vector<8x1xf32>
      %c0_37 = arith.constant 0 : index
      %c0_38 = arith.constant 0 : index
      %48 = vector.load %arg11[%c0_37, %c0_38] : memref<8x8xf32, #tpu.memory_space<vmem>>, vector<8x8xf32>
      %49 = vector.broadcast %47 : vector<8x1xf32> to vector<8x8xf32>
      %50 = arith.mulf %48, %49 : vector<8x8xf32>
      %c0_39 = arith.constant 0 : index
      %c0_40 = arith.constant 0 : index
      %c0_41 = arith.constant 0 : index
      %c0_42 = arith.constant 0 : index
      %51 = vector.load %arg8[%c0_39, %c0_40, %c0_41, %c0_42] : memref<1x1x8x8xf32, #tpu.memory_space<vmem>>, vector<1x1x8x8xf32>
      %52 = vector.shape_cast %51 : vector<1x1x8x8xf32> to vector<8x8xf32>
      %53 = vector.shape_cast %50 : vector<8x8xf32> to vector<1x1x8x8xf32>
      tpu.vector_store %arg8[%c0_39, %c0_40, %c0_41, %c0_42], %53 {strides = array<i32>} : memref<1x1x8x8xf32, #tpu.memory_space<vmem>>, vector<1x1x8x8xf32>,
    } else {
    }
    return
  }
  func.func @transform_0(%arg0: i32, %arg1: i32, %arg2: i32, %arg3: i32) -> (i32, i32, i32, i32) {
    %c0_i32 = arith.constant 0 : i32
    %c0_i32_0 = arith.constant 0 : i32
    return %arg0, %arg1, %arg2, %c0_i32 : i32, i32, i32, i32
  }
  func.func @transform_1(%arg0: i32, %arg1: i32, %arg2: i32, %arg3: i32) -> (i32, i32, i32, i32) {
    %c0_i32 = arith.constant 0 : i32
    %c0_i32_0 = arith.constant 0 : i32
    return %arg0, %arg1, %arg3, %c0_i32 : i32, i32, i32, i32
  }
  func.func @transform_2(%arg0: i32, %arg1: i32, %arg2: i32, %arg3: i32) -> (i32, i32, i32, i32) {
    %c0_i32 = arith.constant 0 : i32
    %c0_i32_0 = arith.constant 0 : i32
    return %arg0, %arg1, %arg3, %c0_i32 : i32, i32, i32, i32
  }
  func.func @transform_3(%arg0: i32, %arg1: i32, %arg2: i32, %arg3: i32) -> (i32, i32, i32) {
    %c0_i32 = arith.constant 0 : i32
    %c0_i32_0 = arith.constant 0 : i32
    return %arg0, %c0_i32, %arg3 : i32, i32, i32
  }
  func.func @transform_4(%arg0: i32, %arg1: i32, %arg2: i32, %arg3: i32) -> (i32, i32, i32, i32) {
    %c0_i32 = arith.constant 0 : i32
    %c0_i32_0 = arith.constant 0 : i32
    return %arg0, %arg1, %arg2, %c0_i32 : i32, i32, i32, i32
  }
}

module attributes {stable_mosaic.version = 11 : i64} {
  func.func @_linear_kernel(%arg0: i32, %arg1: i32, %arg2: i32, %arg3: memref<16x32xbf16, #tpu.memory_space<vmem>>, %arg4: memref<32x32xbf16, #tpu.memory_space<vmem>>, %arg5: memref<1x32xf32, #tpu.memory_space<vmem>>, %arg6: memref<16x32xf32, #tpu.memory_space<vmem>>, %arg7: memref<16x32xf32, #tpu.memory_space<vmem>>) attributes {dimension_semantics = [#tpu.dimension_semantics<parallel>, #tpu.dimension_semantics<parallel>, #tpu.dimension_semantics<arbitrary>], iteration_bounds = array<i64: 1, 1, 1>, scalar_prefetch = 0 : i64, scratch_operands = 1 : i64, tpu.core_type = #tpu.core_type<tc>, window_params = [{transform_indices = @transform_0, window_bounds = array<i64: 16, 32>}, {transform_indices = @transform_1, window_bounds = array<i64: 32, 32>}, {transform_indices = @transform_2, window_bounds = array<i64: 1, 32>}, {transform_indices = @transform_3, window_bounds = array<i64: 16, 32>}]} {
    %c0_i32 = arith.constant 0 : i32
    %0 = arith.cmpi eq, %arg2, %c0_i32 : i32
    %1 = arith.extui %0 : i1 to i32
    %c0_i32_0 = arith.constant 0 : i32
    %2 = arith.cmpi ne, %1, %c0_i32_0 : i32
    scf.if %2 {
      %cst_10 = arith.constant 0.000000e+00 : f32
      %12 = vector.broadcast %cst_10 : f32 to vector<16x32xf32>
      %c0_11 = arith.constant 0 : index
      %c0_12 = arith.constant 0 : index
      %13 = vector.load %arg7[%c0_11, %c0_12] : memref<16x32xf32, #tpu.memory_space<vmem>>, vector<16x32xf32>
      tpu.vector_store %arg7[%c0_11, %c0_12], %12 {strides = array<i32>} : memref<16x32xf32, #tpu.memory_space<vmem>>, vector<16x32xf32>,
    } else {
    }
    %c0 = arith.constant 0 : index
    %c0_1 = arith.constant 0 : index
    %3 = vector.load %arg7[%c0, %c0_1] : memref<16x32xf32, #tpu.memory_space<vmem>>, vector<16x32xf32>
    %c0_2 = arith.constant 0 : index
    %c0_3 = arith.constant 0 : index
    %4 = vector.load %arg3[%c0_2, %c0_3] : memref<16x32xbf16, #tpu.memory_space<vmem>>, vector<16x32xbf16>
    %c0_4 = arith.constant 0 : index
    %c0_5 = arith.constant 0 : index
    %5 = vector.load %arg4[%c0_4, %c0_5] : memref<32x32xbf16, #tpu.memory_space<vmem>>, vector<32x32xbf16>
    %cst = arith.constant dense<0.000000e+00> : vector<16x32xf32>
    %6 = tpu.matmul %4, %5, %cst {dimension_numbers = #tpu.dot_dimension_numbers<[1], [0], [0], [1], [0, 0, 1, 1], [], []>} : vector<16x32xbf16>, vector<32x32xbf16>, vector<16x32xf32> -> vector<16x32xf32>
    %7 = arith.addf %3, %6 : vector<16x32xf32>
    %c0_6 = arith.constant 0 : index
    %c0_7 = arith.constant 0 : index
    %8 = vector.load %arg7[%c0_6, %c0_7] : memref<16x32xf32, #tpu.memory_space<vmem>>, vector<16x32xf32>
    tpu.vector_store %arg7[%c0_6, %c0_7], %7 {strides = array<i32>} : memref<16x32xf32, #tpu.memory_space<vmem>>, vector<16x32xf32>,
    %c0_i32_8 = arith.constant 0 : i32
    %9 = arith.cmpi eq, %arg2, %c0_i32_8 : i32
    %10 = arith.extui %9 : i1 to i32
    %c0_i32_9 = arith.constant 0 : i32
    %11 = arith.cmpi ne, %10, %c0_i32_9 : i32
    scf.if %11 {
      %c0_10 = arith.constant 0 : index
      %c0_11 = arith.constant 0 : index
      %12 = vector.load %arg7[%c0_10, %c0_11] : memref<16x32xf32, #tpu.memory_space<vmem>>, vector<16x32xf32>
      %c0_12 = arith.constant 0 : index
      %c0_13 = arith.constant 0 : index
      %13 = vector.load %arg5[%c0_12, %c0_13] : memref<1x32xf32, #tpu.memory_space<vmem>>, vector<1x32xf32>
      %14 = vector.broadcast %13 : vector<1x32xf32> to vector<16x32xf32>
      %15 = arith.addf %12, %14 : vector<16x32xf32>
      %c0_14 = arith.constant 0 : index
      %c0_15 = arith.constant 0 : index
      %16 = vector.load %arg6[%c0_14, %c0_15] : memref<16x32xf32, #tpu.memory_space<vmem>>, vector<16x32xf32>
      tpu.vector_store %arg6[%c0_14, %c0_15], %15 {strides = array<i32>} : memref<16x32xf32, #tpu.memory_space<vmem>>, vector<16x32xf32>,
    } else {
    }
    return
  }
  func.func @transform_0(%arg0: i32, %arg1: i32, %arg2: i32) -> (i32, i32) {
    %c0_i32 = arith.constant 0 : i32
    return %arg0, %arg2 : i32, i32
  }
  func.func @transform_1(%arg0: i32, %arg1: i32, %arg2: i32) -> (i32, i32) {
    %c0_i32 = arith.constant 0 : i32
    return %arg2, %arg1 : i32, i32
  }
  func.func @transform_2(%arg0: i32, %arg1: i32, %arg2: i32) -> (i32, i32) {
    %c0_i32 = arith.constant 0 : i32
    %c0_i32_0 = arith.constant 0 : i32
    return %c0_i32, %arg1 : i32, i32
  }
  func.func @transform_3(%arg0: i32, %arg1: i32, %arg2: i32) -> (i32, i32) {
    %c0_i32 = arith.constant 0 : i32
    return %arg0, %arg1 : i32, i32
  }
}

module attributes {stable_mosaic.version = 11 : i64} {
  func.func @_linear_kernel(%arg0: i32, %arg1: i32, %arg2: i32, %arg3: memref<16x32xbf16, #tpu.memory_space<vmem>>, %arg4: memref<32x64xbf16, #tpu.memory_space<vmem>>, %arg5: memref<1x64xf32, #tpu.memory_space<vmem>>, %arg6: memref<16x64xf32, #tpu.memory_space<vmem>>, %arg7: memref<16x64xf32, #tpu.memory_space<vmem>>) attributes {dimension_semantics = [#tpu.dimension_semantics<parallel>, #tpu.dimension_semantics<parallel>, #tpu.dimension_semantics<arbitrary>], iteration_bounds = array<i64: 1, 1, 1>, scalar_prefetch = 0 : i64, scratch_operands = 1 : i64, tpu.core_type = #tpu.core_type<tc>, window_params = [{transform_indices = @transform_0, window_bounds = array<i64: 16, 32>}, {transform_indices = @transform_1, window_bounds = array<i64: 32, 64>}, {transform_indices = @transform_2, window_bounds = array<i64: 1, 64>}, {transform_indices = @transform_3, window_bounds = array<i64: 16, 64>}]} {
    %c0_i32 = arith.constant 0 : i32
    %0 = arith.cmpi eq, %arg2, %c0_i32 : i32
    %1 = arith.extui %0 : i1 to i32
    %c0_i32_0 = arith.constant 0 : i32
    %2 = arith.cmpi ne, %1, %c0_i32_0 : i32
    scf.if %2 {
      %cst_10 = arith.constant 0.000000e+00 : f32
      %12 = vector.broadcast %cst_10 : f32 to vector<16x64xf32>
      %c0_11 = arith.constant 0 : index
      %c0_12 = arith.constant 0 : index
      %13 = vector.load %arg7[%c0_11, %c0_12] : memref<16x64xf32, #tpu.memory_space<vmem>>, vector<16x64xf32>
      tpu.vector_store %arg7[%c0_11, %c0_12], %12 {strides = array<i32>} : memref<16x64xf32, #tpu.memory_space<vmem>>, vector<16x64xf32>,
    } else {
    }
    %c0 = arith.constant 0 : index
    %c0_1 = arith.constant 0 : index
    %3 = vector.load %arg7[%c0, %c0_1] : memref<16x64xf32, #tpu.memory_space<vmem>>, vector<16x64xf32>
    %c0_2 = arith.constant 0 : index
    %c0_3 = arith.constant 0 : index
    %4 = vector.load %arg3[%c0_2, %c0_3] : memref<16x32xbf16, #tpu.memory_space<vmem>>, vector<16x32xbf16>
    %c0_4 = arith.constant 0 : index
    %c0_5 = arith.constant 0 : index
    %5 = vector.load %arg4[%c0_4, %c0_5] : memref<32x64xbf16, #tpu.memory_space<vmem>>, vector<32x64xbf16>
    %cst = arith.constant dense<0.000000e+00> : vector<16x64xf32>
    %6 = tpu.matmul %4, %5, %cst {dimension_numbers = #tpu.dot_dimension_numbers<[1], [0], [0], [1], [0, 0, 1, 1], [], []>} : vector<16x32xbf16>, vector<32x64xbf16>, vector<16x64xf32> -> vector<16x64xf32>
    %7 = arith.addf %3, %6 : vector<16x64xf32>
    %c0_6 = arith.constant 0 : index
    %c0_7 = arith.constant 0 : index
    %8 = vector.load %arg7[%c0_6, %c0_7] : memref<16x64xf32, #tpu.memory_space<vmem>>, vector<16x64xf32>
    tpu.vector_store %arg7[%c0_6, %c0_7], %7 {strides = array<i32>} : memref<16x64xf32, #tpu.memory_space<vmem>>, vector<16x64xf32>,
    %c0_i32_8 = arith.constant 0 : i32
    %9 = arith.cmpi eq, %arg2, %c0_i32_8 : i32
    %10 = arith.extui %9 : i1 to i32
    %c0_i32_9 = arith.constant 0 : i32
    %11 = arith.cmpi ne, %10, %c0_i32_9 : i32
    scf.if %11 {
      %c0_10 = arith.constant 0 : index
      %c0_11 = arith.constant 0 : index
      %12 = vector.load %arg7[%c0_10, %c0_11] : memref<16x64xf32, #tpu.memory_space<vmem>>, vector<16x64xf32>
      %c0_12 = arith.constant 0 : index
      %c0_13 = arith.constant 0 : index
      %13 = vector.load %arg5[%c0_12, %c0_13] : memref<1x64xf32, #tpu.memory_space<vmem>>, vector<1x64xf32>
      %14 = vector.broadcast %13 : vector<1x64xf32> to vector<16x64xf32>
      %15 = arith.addf %12, %14 : vector<16x64xf32>
      %cst_14 = arith.constant 5.000000e-01 : f32
      %16 = vector.broadcast %cst_14 : f32 to vector<16x64xf32>
      %17 = arith.mulf %16, %15 : vector<16x64xf32>
      %cst_15 = arith.constant 0.707106769 : f32
      %18 = vector.broadcast %cst_15 : f32 to vector<16x64xf32>
      %19 = arith.mulf %15, %18 : vector<16x64xf32>
      %20 = math.erf %19 : vector<16x64xf32>
      %cst_16 = arith.constant 1.000000e+00 : f32
      %21 = vector.broadcast %cst_16 : f32 to vector<16x64xf32>
      %22 = arith.addf %21, %20 : vector<16x64xf32>
      %23 = arith.mulf %17, %22 : vector<16x64xf32>
      %c0_17 = arith.constant 0 : index
      %c0_18 = arith.constant 0 : index
      %24 = vector.load %arg6[%c0_17, %c0_18] : memref<16x64xf32, #tpu.memory_space<vmem>>, vector<16x64xf32>
      tpu.vector_store %arg6[%c0_17, %c0_18], %23 {strides = array<i32>} : memref<16x64xf32, #tpu.memory_space<vmem>>, vector<16x64xf32>,
    } else {
    }
    return
  }
  func.func @transform_0(%arg0: i32, %arg1: i32, %arg2: i32) -> (i32, i32) {
    %c0_i32 = arith.constant 0 : i32
    return %arg0, %arg2 : i32, i32
  }
  func.func @transform_1(%arg0: i32, %arg1: i32, %arg2: i32) -> (i32, i32) {
    %c0_i32 = arith.constant 0 : i32
    return %arg2, %arg1 : i32, i32
  }
  func.func @transform_2(%arg0: i32, %arg1: i32, %arg2: i32) -> (i32, i32) {
    %c0_i32 = arith.constant 0 : i32
    %c0_i32_0 = arith.constant 0 : i32
    return %c0_i32, %arg1 : i32, i32
  }
  func.func @transform_3(%arg0: i32, %arg1: i32, %arg2: i32) -> (i32, i32) {
    %c0_i32 = arith.constant 0 : i32
    return %arg0, %arg1 : i32, i32
  }
}

module attributes {stable_mosaic.version = 11 : i64} {
  func.func @_add_ln_kernel(%arg0: i32, %arg1: memref<16x32xf32, #tpu.memory_space<vmem>>, %arg2: memref<16x32xf32, #tpu.memory_space<vmem>>, %arg3: memref<1x32xf32, #tpu.memory_space<vmem>>, %arg4: memref<1x32xf32, #tpu.memory_space<vmem>>, %arg5: memref<16x32xf32, #tpu.memory_space<vmem>>) attributes {dimension_semantics = [#tpu.dimension_semantics<parallel>], iteration_bounds = array<i64: 1>, scalar_prefetch = 0 : i64, scratch_operands = 0 : i64, tpu.core_type = #tpu.core_type<tc>, window_params = [{transform_indices = @transform_0, window_bounds = array<i64: 16, 32>}, {transform_indices = @transform_1, window_bounds = array<i64: 16, 32>}, {pipeline_mode = #tpu.pipeline_mode<synchronous>, transform_indices = @transform_2, window_bounds = array<i64: 1, 32>}, {pipeline_mode = #tpu.pipeline_mode<synchronous>, transform_indices = @transform_3, window_bounds = array<i64: 1, 32>}, {transform_indices = @transform_4, window_bounds = array<i64: 16, 32>}]} {
    %c0 = arith.constant 0 : index
    %c0_0 = arith.constant 0 : index
    %0 = vector.load %arg1[%c0, %c0_0] : memref<16x32xf32, #tpu.memory_space<vmem>>, vector<16x32xf32>
    %c0_1 = arith.constant 0 : index
    %c0_2 = arith.constant 0 : index
    %1 = vector.load %arg2[%c0_1, %c0_2] : memref<16x32xf32, #tpu.memory_space<vmem>>, vector<16x32xf32>
    %2 = arith.addf %0, %1 : vector<16x32xf32>
    %cst = arith.constant dense<0.000000e+00> : vector<16xf32>
    %3 = vector.multi_reduction <add>, %2, %cst [1] : vector<16x32xf32> to vector<16xf32>
    %4 = vector.shape_cast %3 : vector<16xf32> to vector<16x1xf32>
    %cst_3 = arith.constant 3.200000e+01 : f32
    %5 = vector.broadcast %cst_3 : f32 to vector<16x1xf32>
    %6 = arith.divf %4, %5 : vector<16x1xf32>
    %7 = vector.broadcast %6 : vector<16x1xf32> to vector<16x32xf32>
    %8 = arith.subf %2, %7 : vector<16x32xf32>
    %9 = arith.mulf %8, %8 : vector<16x32xf32>
    %cst_4 = arith.constant dense<0.000000e+00> : vector<16xf32>
    %10 = vector.multi_reduction <add>, %9, %cst_4 [1] : vector<16x32xf32> to vector<16xf32>
    %11 = vector.shape_cast %10 : vector<16xf32> to vector<16x1xf32>
    %cst_5 = arith.constant 3.200000e+01 : f32
    %12 = vector.broadcast %cst_5 : f32 to vector<16x1xf32>
    %13 = arith.divf %11, %12 : vector<16x1xf32>
    %14 = vector.broadcast %6 : vector<16x1xf32> to vector<16x32xf32>
    %15 = arith.subf %2, %14 : vector<16x32xf32>
    %cst_6 = arith.constant 9.99999996E-13 : f32
    %16 = vector.broadcast %cst_6 : f32 to vector<16x1xf32>
    %17 = arith.addf %13, %16 : vector<16x1xf32>
    %18 = math.rsqrt %17 : vector<16x1xf32>
    %19 = vector.broadcast %18 : vector<16x1xf32> to vector<16x32xf32>
    %20 = arith.mulf %15, %19 : vector<16x32xf32>
    %c0_7 = arith.constant 0 : index
    %c0_8 = arith.constant 0 : index
    %21 = vector.load %arg3[%c0_7, %c0_8] : memref<1x32xf32, #tpu.memory_space<vmem>>, vector<1x32xf32>
    %22 = vector.broadcast %21 : vector<1x32xf32> to vector<16x32xf32>
    %23 = arith.mulf %20, %22 : vector<16x32xf32>
    %c0_9 = arith.constant 0 : index
    %c0_10 = arith.constant 0 : index
    %24 = vector.load %arg4[%c0_9, %c0_10] : memref<1x32xf32, #tpu.memory_space<vmem>>, vector<1x32xf32>
    %25 = vector.broadcast %24 : vector<1x32xf32> to vector<16x32xf32>
    %26 = arith.addf %23, %25 : vector<16x32xf32>
    %c0_11 = arith.constant 0 : index
    %c0_12 = arith.constant 0 : index
    %27 = vector.load %arg5[%c0_11, %c0_12] : memref<16x32xf32, #tpu.memory_space<vmem>>, vector<16x32xf32>
    tpu.vector_store %arg5[%c0_11, %c0_12], %26 {strides = array<i32>} : memref<16x32xf32, #tpu.memory_space<vmem>>, vector<16x32xf32>,
    return
  }
  func.func @transform_0(%arg0: i32) -> (i32, i32) {
    %c0_i32 = arith.constant 0 : i32
    %c0_i32_0 = arith.constant 0 : i32
    return %arg0, %c0_i32 : i32, i32
  }
  func.func @transform_1(%arg0: i32) -> (i32, i32) {
    %c0_i32 = arith.constant 0 : i32
    %c0_i32_0 = arith.constant 0 : i32
    return %arg0, %c0_i32 : i32, i32
  }
  func.func @transform_2(%arg0: i32) -> (i32, i32) {
    %c0_i32 = arith.constant 0 : i32
    %c0_i32_0 = arith.constant 0 : i32
    %c0_i32_1 = arith.constant 0 : i32
    return %c0_i32, %c0_i32_0 : i32, i32
  }
  func.func @transform_3(%arg0: i32) -> (i32, i32) {
    %c0_i32 = arith.constant 0 : i32
    %c0_i32_0 = arith.constant 0 : i32
    %c0_i32_1 = arith.constant 0 : i32
    return %c0_i32, %c0_i32_0 : i32, i32
  }
  func.func @transform_4(%arg0: i32) -> (i32, i32) {
    %c0_i32 = arith.constant 0 : i32
    %c0_i32_0 = arith.constant 0 : i32
    return %arg0, %c0_i32 : i32, i32
  }
}

module attributes {stable_mosaic.version = 11 : i64} {
  func.func @_linear_kernel(%arg0: i32, %arg1: i32, %arg2: i32, %arg3: memref<16x64xbf16, #tpu.memory_space<vmem>>, %arg4: memref<64x32xbf16, #tpu.memory_space<vmem>>, %arg5: memref<1x32xf32, #tpu.memory_space<vmem>>, %arg6: memref<16x32xf32, #tpu.memory_space<vmem>>, %arg7: memref<16x32xf32, #tpu.memory_space<vmem>>) attributes {dimension_semantics = [#tpu.dimension_semantics<parallel>, #tpu.dimension_semantics<parallel>, #tpu.dimension_semantics<arbitrary>], iteration_bounds = array<i64: 1, 1, 1>, scalar_prefetch = 0 : i64, scratch_operands = 1 : i64, tpu.core_type = #tpu.core_type<tc>, window_params = [{transform_indices = @transform_0, window_bounds = array<i64: 16, 64>}, {transform_indices = @transform_1, window_bounds = array<i64: 64, 32>}, {transform_indices = @transform_2, window_bounds = array<i64: 1, 32>}, {transform_indices = @transform_3, window_bounds = array<i64: 16, 32>}]} {
    %c0_i32 = arith.constant 0 : i32
    %0 = arith.cmpi eq, %arg2, %c0_i32 : i32
    %1 = arith.extui %0 : i1 to i32
    %c0_i32_0 = arith.constant 0 : i32
    %2 = arith.cmpi ne, %1, %c0_i32_0 : i32
    scf.if %2 {
      %cst_10 = arith.constant 0.000000e+00 : f32
      %12 = vector.broadcast %cst_10 : f32 to vector<16x32xf32>
      %c0_11 = arith.constant 0 : index
      %c0_12 = arith.constant 0 : index
      %13 = vector.load %arg7[%c0_11, %c0_12] : memref<16x32xf32, #tpu.memory_space<vmem>>, vector<16x32xf32>
      tpu.vector_store %arg7[%c0_11, %c0_12], %12 {strides = array<i32>} : memref<16x32xf32, #tpu.memory_space<vmem>>, vector<16x32xf32>,
    } else {
    }
    %c0 = arith.constant 0 : index
    %c0_1 = arith.constant 0 : index
    %3 = vector.load %arg7[%c0, %c0_1] : memref<16x32xf32, #tpu.memory_space<vmem>>, vector<16x32xf32>
    %c0_2 = arith.constant 0 : index
    %c0_3 = arith.constant 0 : index
    %4 = vector.load %arg3[%c0_2, %c0_3] : memref<16x64xbf16, #tpu.memory_space<vmem>>, vector<16x64xbf16>
    %c0_4 = arith.constant 0 : index
    %c0_5 = arith.constant 0 : index
    %5 = vector.load %arg4[%c0_4, %c0_5] : memref<64x32xbf16, #tpu.memory_space<vmem>>, vector<64x32xbf16>
    %cst = arith.constant dense<0.000000e+00> : vector<16x32xf32>
    %6 = tpu.matmul %4, %5, %cst {dimension_numbers = #tpu.dot_dimension_numbers<[1], [0], [0], [1], [0, 0, 1, 1], [], []>} : vector<16x64xbf16>, vector<64x32xbf16>, vector<16x32xf32> -> vector<16x32xf32>
    %7 = arith.addf %3, %6 : vector<16x32xf32>
    %c0_6 = arith.constant 0 : index
    %c0_7 = arith.constant 0 : index
    %8 = vector.load %arg7[%c0_6, %c0_7] : memref<16x32xf32, #tpu.memory_space<vmem>>, vector<16x32xf32>
    tpu.vector_store %arg7[%c0_6, %c0_7], %7 {strides = array<i32>} : memref<16x32xf32, #tpu.memory_space<vmem>>, vector<16x32xf32>,
    %c0_i32_8 = arith.constant 0 : i32
    %9 = arith.cmpi eq, %arg2, %c0_i32_8 : i32
    %10 = arith.extui %9 : i1 to i32
    %c0_i32_9 = arith.constant 0 : i32
    %11 = arith.cmpi ne, %10, %c0_i32_9 : i32
    scf.if %11 {
      %c0_10 = arith.constant 0 : index
      %c0_11 = arith.constant 0 : index
      %12 = vector.load %arg7[%c0_10, %c0_11] : memref<16x32xf32, #tpu.memory_space<vmem>>, vector<16x32xf32>
      %c0_12 = arith.constant 0 : index
      %c0_13 = arith.constant 0 : index
      %13 = vector.load %arg5[%c0_12, %c0_13] : memref<1x32xf32, #tpu.memory_space<vmem>>, vector<1x32xf32>
      %14 = vector.broadcast %13 : vector<1x32xf32> to vector<16x32xf32>
      %15 = arith.addf %12, %14 : vector<16x32xf32>
      %c0_14 = arith.constant 0 : index
      %c0_15 = arith.constant 0 : index
      %16 = vector.load %arg6[%c0_14, %c0_15] : memref<16x32xf32, #tpu.memory_space<vmem>>, vector<16x32xf32>
      tpu.vector_store %arg6[%c0_14, %c0_15], %15 {strides = array<i32>} : memref<16x32xf32, #tpu.memory_space<vmem>>, vector<16x32xf32>,
    } else {
    }
    return
  }
  func.func @transform_0(%arg0: i32, %arg1: i32, %arg2: i32) -> (i32, i32) {
    %c0_i32 = arith.constant 0 : i32
    return %arg0, %arg2 : i32, i32
  }
  func.func @transform_1(%arg0: i32, %arg1: i32, %arg2: i32) -> (i32, i32) {
    %c0_i32 = arith.constant 0 : i32
    return %arg2, %arg1 : i32, i32
  }
  func.func @transform_2(%arg0: i32, %arg1: i32, %arg2: i32) -> (i32, i32) {
    %c0_i32 = arith.constant 0 : i32
    %c0_i32_0 = arith.constant 0 : i32
    return %c0_i32, %arg1 : i32, i32
  }
  func.func @transform_3(%arg0: i32, %arg1: i32, %arg2: i32) -> (i32, i32) {
    %c0_i32 = arith.constant 0 : i32
    return %arg0, %arg1 : i32, i32
  }
}

module attributes {stable_mosaic.version = 11 : i64} {
  func.func @_linear_kernel(%arg0: i32, %arg1: i32, %arg2: i32, %arg3: memref<8x32xbf16, #tpu.memory_space<vmem>>, %arg4: memref<32x128xbf16, #tpu.memory_space<vmem>>, %arg5: memref<1x128xf32, #tpu.memory_space<vmem>>, %arg6: memref<8x128xf32, #tpu.memory_space<vmem>>, %arg7: memref<8x128xf32, #tpu.memory_space<vmem>>) attributes {dimension_semantics = [#tpu.dimension_semantics<parallel>, #tpu.dimension_semantics<parallel>, #tpu.dimension_semantics<arbitrary>], iteration_bounds = array<i64: 1, 1, 1>, scalar_prefetch = 0 : i64, scratch_operands = 1 : i64, tpu.core_type = #tpu.core_type<tc>, window_params = [{transform_indices = @transform_0, window_bounds = array<i64: 8, 32>}, {transform_indices = @transform_1, window_bounds = array<i64: 32, 128>}, {transform_indices = @transform_2, window_bounds = array<i64: 1, 128>}, {transform_indices = @transform_3, window_bounds = array<i64: 8, 128>}]} {
    %c0_i32 = arith.constant 0 : i32
    %0 = arith.cmpi eq, %arg2, %c0_i32 : i32
    %1 = arith.extui %0 : i1 to i32
    %c0_i32_0 = arith.constant 0 : i32
    %2 = arith.cmpi ne, %1, %c0_i32_0 : i32
    scf.if %2 {
      %cst_10 = arith.constant 0.000000e+00 : f32
      %12 = vector.broadcast %cst_10 : f32 to vector<8x128xf32>
      %c0_11 = arith.constant 0 : index
      %c0_12 = arith.constant 0 : index
      %13 = vector.load %arg7[%c0_11, %c0_12] : memref<8x128xf32, #tpu.memory_space<vmem>>, vector<8x128xf32>
      tpu.vector_store %arg7[%c0_11, %c0_12], %12 {strides = array<i32>} : memref<8x128xf32, #tpu.memory_space<vmem>>, vector<8x128xf32>,
    } else {
    }
    %c0 = arith.constant 0 : index
    %c0_1 = arith.constant 0 : index
    %3 = vector.load %arg7[%c0, %c0_1] : memref<8x128xf32, #tpu.memory_space<vmem>>, vector<8x128xf32>
    %c0_2 = arith.constant 0 : index
    %c0_3 = arith.constant 0 : index
    %4 = vector.load %arg3[%c0_2, %c0_3] : memref<8x32xbf16, #tpu.memory_space<vmem>>, vector<8x32xbf16>
    %c0_4 = arith.constant 0 : index
    %c0_5 = arith.constant 0 : index
    %5 = vector.load %arg4[%c0_4, %c0_5] : memref<32x128xbf16, #tpu.memory_space<vmem>>, vector<32x128xbf16>
    %cst = arith.constant dense<0.000000e+00> : vector<8x128xf32>
    %6 = tpu.matmul %4, %5, %cst {dimension_numbers = #tpu.dot_dimension_numbers<[1], [0], [0], [1], [0, 0, 1, 1], [], []>} : vector<8x32xbf16>, vector<32x128xbf16>, vector<8x128xf32> -> vector<8x128xf32>
    %7 = arith.addf %3, %6 : vector<8x128xf32>
    %c0_6 = arith.constant 0 : index
    %c0_7 = arith.constant 0 : index
    %8 = vector.load %arg7[%c0_6, %c0_7] : memref<8x128xf32, #tpu.memory_space<vmem>>, vector<8x128xf32>
    tpu.vector_store %arg7[%c0_6, %c0_7], %7 {strides = array<i32>} : memref<8x128xf32, #tpu.memory_space<vmem>>, vector<8x128xf32>,
    %c0_i32_8 = arith.constant 0 : i32
    %9 = arith.cmpi eq, %arg2, %c0_i32_8 : i32
    %10 = arith.extui %9 : i1 to i32
    %c0_i32_9 = arith.constant 0 : i32
    %11 = arith.cmpi ne, %10, %c0_i32_9 : i32
    scf.if %11 {
      %c0_10 = arith.constant 0 : index
      %c0_11 = arith.constant 0 : index
      %12 = vector.load %arg7[%c0_10, %c0_11] : memref<8x128xf32, #tpu.memory_space<vmem>>, vector<8x128xf32>
      %c0_12 = arith.constant 0 : index
      %c0_13 = arith.constant 0 : index
      %13 = vector.load %arg5[%c0_12, %c0_13] : memref<1x128xf32, #tpu.memory_space<vmem>>, vector<1x128xf32>
      %14 = vector.broadcast %13 : vector<1x128xf32> to vector<8x128xf32>
      %15 = arith.addf %12, %14 : vector<8x128xf32>
      %c0_14 = arith.constant 0 : index
      %c0_15 = arith.constant 0 : index
      %16 = vector.load %arg6[%c0_14, %c0_15] : memref<8x128xf32, #tpu.memory_space<vmem>>, vector<8x128xf32>
      tpu.vector_store %arg6[%c0_14, %c0_15], %15 {strides = array<i32>} : memref<8x128xf32, #tpu.memory_space<vmem>>, vector<8x128xf32>,
    } else {
    }
    return
  }
  func.func @transform_0(%arg0: i32, %arg1: i32, %arg2: i32) -> (i32, i32) {
    %c0_i32 = arith.constant 0 : i32
    return %arg0, %arg2 : i32, i32
  }
  func.func @transform_1(%arg0: i32, %arg1: i32, %arg2: i32) -> (i32, i32) {
    %c0_i32 = arith.constant 0 : i32
    return %arg2, %arg1 : i32, i32
  }
  func.func @transform_2(%arg0: i32, %arg1: i32, %arg2: i32) -> (i32, i32) {
    %c0_i32 = arith.constant 0 : i32
    %c0_i32_0 = arith.constant 0 : i32
    return %c0_i32, %arg1 : i32, i32
  }
  func.func @transform_3(%arg0: i32, %arg1: i32, %arg2: i32) -> (i32, i32) {
    %c0_i32 = arith.constant 0 : i32
    return %arg0, %arg1 : i32, i32
  }
}

</mosaic_0001>

<bundles_post_ra>
// kernel: bert_classifier_forward.17
= control target key start
LH: loop header
LB: loop body
LE: loop exit
PB: predicated region body
PF: predicated region fallthrough
CT: control target
= control target key end

     0   :  { %vm19_vm0 = vcmask 785408   ;;  %v105_v1 = vmov 0.0   ;;  %vm47_vm1 = vcmask 261120   ;;  %s150_s1 = inlined_call_operand.vmem [shape: bf16[32,96], index: 1, kind: input, shape index: {}]   ;;  %s151_s2 = inlined_call_operand.vmem [shape: f32[1,96], index: 2, kind: input, shape index: {}]   ;;  %s152_s0 = inlined_call_operand.vmem [shape: bf16[16,32], index: 0, kind: input, shape index: {}]   ;;  %s153_s3 = inlined_call_operand.vmem [shape: f32[16,96], index: 3, kind: output, shape index: {}]  }
   0x1   :  { %v102_v0 = vld [vmem:[%s150_s1 + $0x8] sm:$0xff]  ;;  %20 = vst.msk [vmem:[#allocation2] sm:$0xff] %vm19_vm0, %v105_v1  ;;  %v101_v2 = vld [vmem:[%s150_s1] sm:$0xff] }
   0x2   :  { %21 = vst.msk [vmem:[#allocation2 + $0x8] sm:$0xff] %vm19_vm0, %v105_v1  ;;  %57 = vmatpush.bf16.msra.mxu0 %v102_v0  ;;  %v100_v3 = vld [vmem:[%s152_s0] sm:$0xff] }
   0x3   :  { %v104_v8 = vld [vmem:[%s151_s2] ss:$0 sm:$0xff] }
   0x6   :  { %58 = vmatpush.bf16.msra.mxu0 %v101_v2 }
   0x8   :  { %v22_v4 = vld [vmem:[#allocation2] sm:$0xff] }
   0x9   :  { %99 = vmatmul.msk.bf16.vlgmr.msra.gmra.mxu0 %vm47_vm1, %v100_v3  ;;  %v23_v7 = vld [vmem:[#allocation2 + $0x8] sm:$0xff] }
  0x86   :  { %v60_v5 = vpop.f32.mrf.mxu0 }
  0x87   :  { %v65_v6 = vadd.f32 %v60_v5, %v22_v4 }
  0x89   :  { %68 = vst.msk [vmem:[#allocation2] sm:$0xff] %vm19_vm0, %v65_v6 }
  0x8e   :  { %v62_v9 = vpop.f32.mrf.mxu0 }
  0x8f   :  { %v66_v10 = vadd.f32 %v62_v9, %v23_v7 }
  0x90   :  { %v73_v11 = vld [vmem:[#allocation2] sm:$0xff] }
  0x91   :  { %v79_v12 = vadd.f32 %v104_v8, %v73_v11  ;;  %69 = vst.msk [vmem:[#allocation2 + $0x8] sm:$0xff] %vm19_vm0, %v66_v10 }
  0x93   :  { %81 = vst.msk [vmem:[%s153_s3] sm:$0xff] %vm19_vm0, %v79_v12 }
  0x98   :  { %v74_v13 = vld [vmem:[#allocation2 + $0x8] sm:$0xff] }
  0x99   :  { %v80_v14 = vadd.f32 %v104_v8, %v74_v13 }
  0x9b   :  { %82 = vst.msk [vmem:[%s153_s3 + $0x8] sm:$0xff] %vm19_vm0, %v80_v14 }

// kernel: bert_classifier_forward.16
= control target key start
LH: loop header
LB: loop body
LE: loop exit
PB: predicated region body
PF: predicated region fallthrough
CT: control target
= control target key end

     0   :  { %vm16_vm0 = vcmask 261120   ;;  %v95_v4 = vmov 32.0   ;;  %s140_s0 = inlined_call_operand.vmem [shape: f32[16,32], index: 0, kind: input, shape index: {}]   ;;  %s141_s1 = inlined_call_operand.vmem [shape: f32[1,32], index: 1, kind: input, shape index: {}]   ;;  %s142_s2 = inlined_call_operand.vmem [shape: f32[1,32], index: 2, kind: input, shape index: {}]   ;;  %s143_s3 = inlined_call_operand.vmem [shape: f32[16,32], index: 3, kind: output, shape index: {}]  }
   0x1   :  { %v14_v0 = vld [vmem:[%s140_s0] sm:$0xff]  ;;  %v15_v2 = vld [vmem:[%s140_s0 + $0x8] sm:$0xff]  ;;  %89 = vrcp.f32 %v95_v4 }
   0x2   :  { %v17_v1 = vsel %vm16_vm0, %v14_v0, 0.0  ;;  %v20_v3 = vsel %vm16_vm0, %v15_v2, 0.0  ;;  %v87_v35 = vld [vmem:[%s141_s1] ss:$0 sm:$0xff] }
   0x3   :  { %18 = vadd.xlane.f32.xlu0 %v17_v1  ;;  %v88_v38 = vld [vmem:[%s142_s2] ss:$0 sm:$0xff] }
   0x7   :  { %v90_v5 = vpop.eup %89 }
   0x8   :  { %v24_v6 = vmul.f32 32.0, %v90_v5  ;;  %vm28_vm1 = vweird.f32 %v90_v5 }
   0xa   :  { %v25_v7 = vsub.f32 1.0, %v24_v6 }
   0xb   :  { %21 = vadd.xlane.f32.xlu0 %v20_v3 }
   0xc   :  { %v26_v8 = vmul.f32 %v90_v5, %v25_v7 }
   0xe   :  { %v27_v9 = vadd.f32 %v90_v5, %v26_v8 }
  0x10   :  { %v29_v10 = vsel %vm28_vm1, %v90_v5, %v27_v9 }
  0x76   :  { %v19_v11 = vpop.xlane.xlu0 %18 }
  0x77   :  { %v30_v12 = vmul.f32 %v29_v10, %v19_v11 }
  0x79   :  { %v32_v13 = vsub.f32 %v14_v0, %v30_v12 }
  0x7b   :  { %v34_v14 = vmul.f32 %v32_v13, %v32_v13 }
  0x7d   :  { %v36_v15 = vsel %vm16_vm0, %v34_v14, 0.0 }
  0x7e   :  { %37 = vadd.xlane.f32.xlu1 %v36_v15  ;;  %v22_v16 = vpop.xlane.xlu0 %21 }
  0x7f   :  { %v31_v17 = vmul.f32 %v29_v10, %v22_v16 }
  0x81   :  { %v33_v18 = vsub.f32 %v15_v2, %v31_v17 }
  0x83   :  { %v35_v19 = vmul.f32 %v33_v18, %v33_v18 }
  0x85   :  { %v39_v20 = vsel %vm16_vm0, %v35_v19, 0.0 }
  0x86   :  { %40 = vadd.xlane.f32.xlu1 %v39_v20 }
  0xf1   :  { %v38_v21 = vpop.xlane.xlu1 %37 }
  0xf2   :  { %v42_v22 = vmul.f32 %v38_v21, %v29_v10 }
  0xf4   :  { %v44_v23 = vadd.f32 1e-12, %v42_v22 }
  0xf6   :  { %91 = vrsqrt.f32 %v44_v23  ;;  %vm52_vm3 = vweird.f32 %v44_v23 }
  0xf9   :  { %v41_v24 = vpop.xlane.xlu1 %40 }
  0xfa   :  { %v43_v25 = vmul.f32 %v41_v24, %v29_v10 }
  0xfc   :  { %v92_v26 = vpop.eup %91  ;;  %v45_v27 = vadd.f32 1e-12, %v43_v25 }
  0xfd   :  { %v47_v28 = vmul.f32 %v92_v26, %v44_v23  ;;  %vm53_vm2 = vweird.f32 %v92_v26 }
  0xfe   :  { %93 = vrsqrt.f32 %v45_v27  ;;  %vm54_vm4 = vmor %vm52_vm3, %vm53_vm2  ;;  %vm62_vm6 = vweird.f32 %v45_v27 }
  0xff   :  { %v48_v29 = vmul.f32 %v92_v26, %v47_v28 }
 0x101   :  { %v49_v30 = vmul.f32 0.5, %v48_v29 }
 0x103   :  { %v50_v31 = vsub.f32 1.5, %v49_v30 }
 0x104   :  { %v94_v32 = vpop.eup %93 }
 0x105   :  { %v51_v33 = vmul.f32 %v92_v26, %v50_v31  ;;  %v57_v34 = vmul.f32 %v94_v32, %v45_v27  ;;  %vm63_vm5 = vweird.f32 %v94_v32 }
 0x106   :  { %vm64_vm7 = vmor %vm62_vm6, %vm63_vm5 }
 0x107   :  { %v55_v36 = vsel %vm54_vm4, %v92_v26, %v51_v33  ;;  %v58_v37 = vmul.f32 %v94_v32, %v57_v34 }
 0x108   :  { %v66_v39 = vmul.f32 %v55_v36, %v32_v13 }
 0x109   :  { %v59_v40 = vmul.f32 0.5, %v58_v37 }
 0x10a   :  { %v72_v41 = vmul.f32 %v87_v35, %v66_v39 }
 0x10b   :  { %v60_v42 = vsub.f32 1.5, %v59_v40 }
 0x10c   :  { %v78_v43 = vadd.f32 %v88_v38, %v72_v41 }
 0x10d   :  { %v61_v44 = vmul.f32 %v94_v32, %v60_v42 }
 0x10e   :  { %80 = vst.msk [vmem:[%s143_s3] sm:$0xff] %vm16_vm0, %v78_v43 }
 0x10f   :  { %v65_v45 = vsel %vm64_vm7, %v94_v32, %v61_v44 }
 0x110   :  { %v67_v46 = vmul.f32 %v65_v45, %v33_v18 }
 0x112   :  { %v73_v47 = vmul.f32 %v87_v35, %v67_v46 }
 0x114   :  { %v79_v48 = vadd.f32 %v88_v38, %v73_v47 }
 0x116   :  { %81 = vst.msk [vmem:[%s143_s3 + $0x8] sm:$0xff] %vm16_vm0, %v79_v48 }

// kernel: bert_classifier_forward.18
= control target key start
LH: loop header
LB: loop body
LE: loop exit
PB: predicated region body
PF: predicated region fallthrough
CT: control target
= control target key end

     0   :  { %s776_s15 = smov 0   ;;  %s778_s16 = smov 0   ;;  %s857_s0 = inlined_call_operand.vmem [shape: bf16[2,4,8,8], index: 0, kind: input, shape index: {}]   ;;  %s858_s1 = inlined_call_operand.vmem [shape: bf16[2,4,8,8], index: 1, kind: input, shape index: {}]   ;;  %s859_s2 = inlined_call_operand.vmem [shape: bf16[2,4,8,8], index: 2, kind: input, shape index: {}]   ;;  %s860_s3 = inlined_call_operand.vmem [shape: f32[2,1,8], index: 3, kind: input, shape index: {}]   ;;  %s861_s4 = inlined_call_operand.vmem [shape: f32[2,4,8,8], index: 4, kind: output, shape index: {}]  }
   0x1   :  { %s780_s17 = smov 0   ;;  %s782_s18 = smov 0  }
   0x2   :  { %s784_s19 = smov 0  }
   0x3 LB: > { %s36_s20 = sadd.s32 1, %s738_s17  ;;  %s40_s21 = sadd.s32 1, %s742_s18  ;;  %s746_s19 = sphi %s784_s19, %s14_s19   ;;  %s742_s18 = sphi %s782_s18, %s865_s18   ;;  %s738_s17 = sphi %s780_s17, %s864_s17   ;;  %s734_s16 = sphi %s778_s16, %s863_s16   ;;  %s730_s15 = sphi %s776_s15, %s862_s15  }
   0x4   : > { %p38_p0 = scmp.ge.s32.totalorder %s36_s20, 4  ;;  %p643_p1 = scmp.ge.s32.totalorder %s746_s19, 1 }
   0x5   : > { %p255_p2 = scmp.lt.s32.totalorder %s746_s19, 9 }
   0x6   : > { %s867_s20 = smov (%p38_p0, %s36_s20), 0  ;;  %s869_s21 = smov (!%p38_p0, %s40_s21), %s742_s18 }
   0x7   : > { %p256_p3 = pnand %p643_p1, %p255_p2  ;;  %p42_p4 = scmp.ge.s32.totalorder %s869_s21, 2 }
   0x8   : > { %p321_p5 = scmp.lt.s32.totalorder (!%p256_p3), %s734_s16, 1  ;;  %p323_p6 = scmp.lt.s32.totalorder (!%p256_p3), %s730_s15, 3 }
   0x9   : > { %s871_s21 = smov (%p42_p4, %s869_s21), 0  ;;  %259 = sbr.rel (%p256_p3) target bundleno = 631 (0x277), region = 36 }
   0xe   : > { %s873_s16 = smov (!%p321_p5, %s734_s16), 1  ;;  %s875_s15 = smov (!%p323_p6, %s730_s15), 3  ;;  %vm379_vm0 = vcmask 64512   ;;  %vm376_vm1 = vcmask 7168   ;;  %v748_v3 = vmov -inf   ;;  %v749_v13 = vmov 0  }
   0xf   : > { %s644_s22 = sshll.u32 %s873_s16, 2  ;;  %377 = vst.msk [vmem:[#allocation2] sm:$0xff] %vm376_vm1, %v748_v3  ;;  %s359_s7 = scalar_lea.vmem %s860_s3, %s873_s16  ;;  %699 = vset.pattern.permute.xlu0 %v749_v13  ;;  %700 = vset.pattern.permute.xlu1 %v749_v13  ;;  %v750_v14 = vmov 0.0   ;;  %vm447_vm2 = vcmask 1043456  }
  0x10   : > { %s806_s23 = sadd.s32 %s644_s22, %s875_s15  ;;  %v384_v4 = vld [vmem:[%s359_s7] sm:$0x1]  ;;  %701 = vset.pattern.permute.xlu2 %v749_v13  ;;  %378 = vst.msk [vmem:[#allocation3] sm:$0xff] %vm376_vm1, %v750_v14 }
  0x11   : > { %s809_s24 = sshll.u32 %s806_s23, 2  ;;  %v406_v5 = vsub.f32 1.0, %v384_v4  ;;  %380 = vst.msk [vmem:[#allocation4] sm:$0xff] %vm379_vm0, %v750_v14  ;;  %s651_s11 = sshll.u32 %s806_s23, 3 }
  0x12   : > { %s342_s27 = scalar_lea.vmem %s858_s1, %s809_s24  ;;  %s331_s30 = scalar_lea.vmem %s857_s0, %s809_s24 }
  0x13   : > { %v382_v0 = vld [vmem:[%s342_s27] sm:$0xf]  ;;  %v407_v6 = vmul.f32 -1e+09, %v406_v5  ;;  %s353_s10 = scalar_lea.vmem %s859_s2, %s809_s24  ;;  %s370_s14 = scalar_lea.vmem %s861_s4, %s651_s11 }
  0x14   : > { %v390_v1 = vsel %vm379_vm0, %v382_v0, 0  ;;  %v381_v2 = vld [vmem:[%s331_s30] sm:$0xf] }
  0x15   : > { %399 = vmatpush.bf16.xpose.msra.mxu0 %v390_v1  ;;  %v409_v7 = vperm.slane %v407_v6, 0  ;;  %v383_v19 = vld [vmem:[%s353_s10] sm:$0xf] }
  0x16   : > { %v412_v15 = vld [vmem:[#allocation2] sm:$0xff]  ;;  %v449_v20 = vsel %vm447_vm2, %v383_v19, 0 }
  0x17   : > { %458 = vmatpush.bf16.msra.mxu1 %v449_v20  ;;  %v428_v29 = vld [vmem:[#allocation3] sm:$0xff] }
  0x18   : > { %v436_v37 = vld [vmem:[#allocation4] sm:$0xff] }
  0x1c   : > { %652 = vmatmul.msk.bf16.vlgmr.msra.gmra.mxu0 %vm379_vm0, %v381_v2 }
  0x99   : > { %v401_v8 = vpop.f32.mrf.mxu0 }
  0x9a   : > { %v405_v9 = vmul.f32 0.35355338, %v401_v8 }
  0x9c   : > { %v411_v10 = vadd.f32 %v409_v7, %v405_v9 }
  0x9e   : > { %v413_v11 = vsel %vm379_vm0, %v411_v10, -inf }
  0x9f   : > { %414 = vmax.xlane.f32.xlu0 %v413_v11 }
  0xa1   : > { %v403_v12 = vpop.f32.mrf.mxu0 }
 0x112   : > { %v415_v16 = vpop.xlane.xlu0 %414 }
 0x113   : > { %v416_v17 = vmax.f32 %v412_v15, %v415_v16 }
 0x115   : > { %v417_v18 = vsub.f32 %v412_v15, %v416_v17  ;;  %466 = vst.msk [vmem:[#allocation2] sm:$0xff] %vm376_vm1, %v416_v17  ;;  %422 = vperm.xlu0 %699, %v416_v17  }
 0x117   : > { %v418_v27 = vmul.f32 1.442695, %v417_v18 }
 0x187   : > { %v423_v21 = vpop.permute.xlu0 %422 }
 0x188   : > { %v425_v22 = vsub.f32 %v411_v10, %v423_v21 }
 0x18a   : > { %v426_v23 = vmul.f32 1.442695, %v425_v22 }
 0x18c   : > { %702 = vpow2.f32 %v426_v23 }
 0x18d   : > { %704 = vpow2.f32 %v418_v27 }
 0x192   : > { %v703_v24 = vpop.eup %702 }
 0x193   : > { %v430_v25 = vsel %vm379_vm0, %v703_v24, 0.0  ;;  %v443_v26 = vpack.c.bf16 %v703_v24, %v703_v24  ;;  %v705_v28 = vpop.eup %704 }
 0x194   : > { %431 = vadd.xlane.f32.xlu1 %v430_v25  ;;  %v429_v30 = vmul.f32 %v705_v28, %v428_v29 }
 0x195   : > { %653 = vmatmul.msk.bf16.vlgmr.msra.gmra.mxu1 %vm379_vm0, %v443_v26 }
 0x1ad   : > { %439 = vperm.xlu1 %700, %v705_v28  }
 0x207   : > { %v432_v31 = vpop.xlane.xlu1 %431 }
 0x208   : > { %v433_v32 = vadd.f32 %v432_v31, %v429_v30 }
 0x20a   : > { %435 = vst.msk [vmem:[#allocation3] sm:$0xff] %vm376_vm1, %v433_v32 }
 0x211   : > { %v470_v33 = vld [vmem:[#allocation3] sm:$0xff] }
 0x212   : > { %v460_v34 = vpop.f32.mrf.mxu1  ;;  %706 = vrcp.f32 %v470_v33 }
 0x218   : > { %v707_v35 = vpop.eup %706 }
 0x219   : > { %475 = vperm.xlu2 %701, %v707_v35  }
 0x21a   : > { %v462_v36 = vpop.f32.mrf.mxu1 }
 0x21f   : > { %v440_v38 = vpop.permute.xlu1 %439 }
 0x220   : > { %v442_v39 = vmul.f32 %v440_v38, %v436_v37 }
 0x222   : > { %v464_v40 = vadd.f32 %v460_v34, %v442_v39 }
 0x224   : > { %465 = vst.msk [vmem:[#allocation4] sm:$0xff] %vm379_vm0, %v464_v40 }
 0x22b   : > { %v472_v41 = vld [vmem:[#allocation4] sm:$0xff] }
 0x273   : > { %v476_v42 = vpop.permute.xlu2 %475 }
 0x274   : > { %v478_v43 = vmul.f32 %v476_v42, %v472_v41 }
 0x276   : > { %479 = vst.msk [vmem:[%s370_s14] sm:$0xff] %vm379_vm0, %v478_v43 }
 0x277 PF: > { %s14_s19 = sadd.s32 1, %s746_s19   ;;  %s862_s15 = smov %s738_s17 }
 0x278   : > { %p11_p7 = scmp.ge.s32.totalorder %s14_s19, 10   ;;  %s863_s16 = smov %s742_s18 }
 0x279   : > { %s864_s17 = smov %s867_s20  ;;  %s865_s18 = smov %s871_s21 }
 0x27a   :  { %13 = sbr.rel (!%p11_p7) target bundleno = 3 (0x3), region = 83 }

// kernel: bert_classifier_forward.19
= control target key start
LH: loop header
LB: loop body
LE: loop exit
PB: predicated region body
PF: predicated region fallthrough
CT: control target
= control target key end

     0   :  { %vm19_vm0 = vcmask 261120   ;;  %v104_v1 = vmov 0.0   ;;  %s150_s1 = inlined_call_operand.vmem [shape: bf16[32,32], index: 1, kind: input, shape index: {}]   ;;  %s151_s2 = inlined_call_operand.vmem [shape: f32[1,32], index: 2, kind: input, shape index: {}]   ;;  %s152_s0 = inlined_call_operand.vmem [shape: bf16[16,32], index: 0, kind: input, shape index: {}]   ;;  %s153_s3 = inlined_call_operand.vmem [shape: f32[16,32], index: 3, kind: output, shape index: {}]  }
   0x1   :  { %v101_v0 = vld [vmem:[%s150_s1 + $0x8] sm:$0xff]  ;;  %20 = vst.msk [vmem:[#allocation2] sm:$0xff] %vm19_vm0, %v104_v1  ;;  %v100_v2 = vld [vmem:[%s150_s1] sm:$0xff] }
   0x2   :  { %21 = vst.msk [vmem:[#allocation2 + $0x8] sm:$0xff] %vm19_vm0, %v104_v1  ;;  %57 = vmatpush.bf16.msra.mxu0 %v101_v0  ;;  %v99_v3 = vld [vmem:[%s152_s0] sm:$0xff] }
   0x3   :  { %v103_v8 = vld [vmem:[%s151_s2] ss:$0 sm:$0xff] }
   0x6   :  { %58 = vmatpush.bf16.msra.mxu0 %v100_v2 }
   0x8   :  { %v22_v4 = vld [vmem:[#allocation2] sm:$0xff] }
   0x9   :  { %98 = vmatmul.msk.bf16.vlgmr.msra.gmra.mxu0 %vm19_vm0, %v99_v3  ;;  %v23_v7 = vld [vmem:[#allocation2 + $0x8] sm:$0xff] }
  0x86   :  { %v60_v5 = vpop.f32.mrf.mxu0 }
  0x87   :  { %v65_v6 = vadd.f32 %v60_v5, %v22_v4 }
  0x89   :  { %67 = vst.msk [vmem:[#allocation2] sm:$0xff] %vm19_vm0, %v65_v6 }
  0x8e   :  { %v62_v9 = vpop.f32.mrf.mxu0 }
  0x8f   :  { %v66_v10 = vadd.f32 %v62_v9, %v23_v7 }
  0x90   :  { %v72_v11 = vld [vmem:[#allocation2] sm:$0xff] }
  0x91   :  { %v78_v12 = vadd.f32 %v103_v8, %v72_v11  ;;  %68 = vst.msk [vmem:[#allocation2 + $0x8] sm:$0xff] %vm19_vm0, %v66_v10 }
  0x93   :  { %80 = vst.msk [vmem:[%s153_s3] sm:$0xff] %vm19_vm0, %v78_v12 }
  0x98   :  { %v73_v13 = vld [vmem:[#allocation2 + $0x8] sm:$0xff] }
  0x99   :  { %v79_v14 = vadd.f32 %v103_v8, %v73_v13 }
  0x9b   :  { %81 = vst.msk [vmem:[%s153_s3 + $0x8] sm:$0xff] %vm19_vm0, %v79_v14 }

// kernel: bert_classifier_forward.20
= control target key start
LH: loop header
LB: loop body
LE: loop exit
PB: predicated region body
PF: predicated region fallthrough
CT: control target
= control target key end

     0   :  { %vm23_vm0 = vcmask 261120   ;;  %v102_v8 = vmov 32.0   ;;  %s158_s0 = inlined_call_operand.vmem [shape: f32[16,32], index: 0, kind: input, shape index: {}]   ;;  %s159_s1 = inlined_call_operand.vmem [shape: f32[16,32], index: 1, kind: input, shape index: {}]   ;;  %s160_s2 = inlined_call_operand.vmem [shape: f32[1,32], index: 2, kind: input, shape index: {}]   ;;  %s161_s3 = inlined_call_operand.vmem [shape: f32[1,32], index: 3, kind: input, shape index: {}]   ;;  %s162_s4 = inlined_call_operand.vmem [shape: f32[16,32], index: 4, kind: output, shape index: {}]  }
   0x1   :  { %v17_v0 = vld [vmem:[%s158_s0] sm:$0xff]  ;;  %v18_v3 = vld [vmem:[%s158_s0 + $0x8] sm:$0xff]  ;;  %96 = vrcp.f32 %v102_v8 }
   0x2   :  { %v19_v1 = vld [vmem:[%s159_s1] sm:$0xff]  ;;  %v20_v4 = vld [vmem:[%s159_s1 + $0x8] sm:$0xff] }
   0x3   :  { %v21_v2 = vadd.f32 %v19_v1, %v17_v0  ;;  %v22_v6 = vadd.f32 %v20_v4, %v18_v3  ;;  %v94_v39 = vld [vmem:[%s160_s2] ss:$0 sm:$0xff] }
   0x4   :  { %v95_v42 = vld [vmem:[%s161_s3] ss:$0 sm:$0xff] }
   0x5   :  { %v24_v5 = vsel %vm23_vm0, %v21_v2, 0.0  ;;  %v27_v7 = vsel %vm23_vm0, %v22_v6, 0.0 }
   0x6   :  { %25 = vadd.xlane.f32.xlu0 %v24_v5 }
   0x7   :  { %v97_v9 = vpop.eup %96 }
   0x8   :  { %v31_v10 = vmul.f32 32.0, %v97_v9  ;;  %vm35_vm1 = vweird.f32 %v97_v9 }
   0xa   :  { %v32_v11 = vsub.f32 1.0, %v31_v10 }
   0xc   :  { %v33_v12 = vmul.f32 %v97_v9, %v32_v11 }
   0xe   :  { %28 = vadd.xlane.f32.xlu0 %v27_v7  ;;  %v34_v13 = vadd.f32 %v97_v9, %v33_v12 }
  0x10   :  { %v36_v14 = vsel %vm35_vm1, %v97_v9, %v34_v13 }
  0x79   :  { %v26_v15 = vpop.xlane.xlu0 %25 }
  0x7a   :  { %v37_v16 = vmul.f32 %v36_v14, %v26_v15 }
  0x7c   :  { %v39_v17 = vsub.f32 %v21_v2, %v37_v16 }
  0x7e   :  { %v41_v18 = vmul.f32 %v39_v17, %v39_v17 }
  0x80   :  { %v43_v19 = vsel %vm23_vm0, %v41_v18, 0.0 }
  0x81   :  { %44 = vadd.xlane.f32.xlu1 %v43_v19  ;;  %v29_v20 = vpop.xlane.xlu0 %28 }
  0x82   :  { %v38_v21 = vmul.f32 %v36_v14, %v29_v20 }
  0x84   :  { %v40_v22 = vsub.f32 %v22_v6, %v38_v21 }
  0x86   :  { %v42_v23 = vmul.f32 %v40_v22, %v40_v22 }
  0x88   :  { %v46_v24 = vsel %vm23_vm0, %v42_v23, 0.0 }
  0x89   :  { %47 = vadd.xlane.f32.xlu1 %v46_v24 }
  0xf4   :  { %v45_v25 = vpop.xlane.xlu1 %44 }
  0xf5   :  { %v49_v26 = vmul.f32 %v45_v25, %v36_v14 }
  0xf7   :  { %v51_v27 = vadd.f32 1e-12, %v49_v26 }
  0xf9   :  { %98 = vrsqrt.f32 %v51_v27  ;;  %vm59_vm3 = vweird.f32 %v51_v27 }
  0xfc   :  { %v48_v28 = vpop.xlane.xlu1 %47 }
  0xfd   :  { %v50_v29 = vmul.f32 %v48_v28, %v36_v14 }
  0xff   :  { %v99_v30 = vpop.eup %98  ;;  %v52_v31 = vadd.f32 1e-12, %v50_v29 }
 0x100   :  { %v54_v32 = vmul.f32 %v99_v30, %v51_v27  ;;  %vm60_vm2 = vweird.f32 %v99_v30 }
 0x101   :  { %100 = vrsqrt.f32 %v52_v31  ;;  %vm61_vm4 = vmor %vm59_vm3, %vm60_vm2  ;;  %vm69_vm6 = vweird.f32 %v52_v31 }
 0x102   :  { %v55_v33 = vmul.f32 %v99_v30, %v54_v32 }
 0x104   :  { %v56_v34 = vmul.f32 0.5, %v55_v33 }
 0x106   :  { %v57_v35 = vsub.f32 1.5, %v56_v34 }
 0x107   :  { %v101_v36 = vpop.eup %100 }
 0x108   :  { %v58_v37 = vmul.f32 %v99_v30, %v57_v35  ;;  %v64_v38 = vmul.f32 %v101_v36, %v52_v31  ;;  %vm70_vm5 = vweird.f32 %v101_v36 }
 0x109   :  { %vm71_vm7 = vmor %vm69_vm6, %vm70_vm5 }
 0x10a   :  { %v62_v40 = vsel %vm61_vm4, %v99_v30, %v58_v37  ;;  %v65_v41 = vmul.f32 %v101_v36, %v64_v38 }
 0x10b   :  { %v73_v43 = vmul.f32 %v62_v40, %v39_v17 }
 0x10c   :  { %v66_v44 = vmul.f32 0.5, %v65_v41 }
 0x10d   :  { %v79_v45 = vmul.f32 %v94_v39, %v73_v43 }
 0x10e   :  { %v67_v46 = vsub.f32 1.5, %v66_v44 }
 0x10f   :  { %v85_v47 = vadd.f32 %v95_v42, %v79_v45 }
 0x110   :  { %v68_v48 = vmul.f32 %v101_v36, %v67_v46 }
 0x111   :  { %87 = vst.msk [vmem:[%s162_s4] sm:$0xff] %vm23_vm0, %v85_v47 }
 0x112   :  { %v72_v49 = vsel %vm71_vm7, %v101_v36, %v68_v48 }
 0x113   :  { %v74_v50 = vmul.f32 %v72_v49, %v40_v22 }
 0x115   :  { %v80_v51 = vmul.f32 %v94_v39, %v74_v50 }
 0x117   :  { %v86_v52 = vadd.f32 %v95_v42, %v80_v51 }
 0x119   :  { %88 = vst.msk [vmem:[%s162_s4 + $0x8] sm:$0xff] %vm23_vm0, %v86_v52 }

// kernel: bert_classifier_forward.21
= control target key start
LH: loop header
LB: loop body
LE: loop exit
PB: predicated region body
PF: predicated region fallthrough
CT: control target
= control target key end

     0   :  { %vm19_vm0 = vcmask 523264   ;;  %v199_v1 = vmov 0.0   ;;  %vm47_vm1 = vcmask 261120   ;;  %s257_s1 = inlined_call_operand.vmem [shape: bf16[32,64], index: 1, kind: input, shape index: {}]   ;;  %s258_s2 = inlined_call_operand.vmem [shape: f32[1,64], index: 2, kind: input, shape index: {}]   ;;  %s259_s0 = inlined_call_operand.vmem [shape: bf16[16,32], index: 0, kind: input, shape index: {}]   ;;  %s260_s3 = inlined_call_operand.vmem [shape: f32[16,64], index: 3, kind: output, shape index: {}]  }
   0x1   :  { %v192_v0 = vld [vmem:[%s257_s1 + $0x8] sm:$0xff]  ;;  %20 = vst.msk [vmem:[#allocation2] sm:$0xff] %vm19_vm0, %v199_v1  ;;  %v191_v2 = vld [vmem:[%s257_s1] sm:$0xff] }
   0x2   :  { %21 = vst.msk [vmem:[#allocation2 + $0x8] sm:$0xff] %vm19_vm0, %v199_v1  ;;  %57 = vmatpush.bf16.msra.mxu0 %v192_v0  ;;  %v190_v3 = vld [vmem:[%s259_s0] sm:$0xff] }
   0x3   :  { %v194_v8 = vld [vmem:[%s258_s2] ss:$0 sm:$0xff] }
   0x6   :  { %58 = vmatpush.bf16.msra.mxu0 %v191_v2 }
   0x8   :  { %v22_v4 = vld [vmem:[#allocation2] sm:$0xff] }
   0x9   :  { %187 = vmatmul.msk.bf16.vlgmr.msra.gmra.mxu0 %vm47_vm1, %v190_v3  ;;  %v23_v7 = vld [vmem:[#allocation2 + $0x8] sm:$0xff] }
  0x86   :  { %v60_v5 = vpop.f32.mrf.mxu0 }
  0x87   :  { %v65_v6 = vadd.f32 %v60_v5, %v22_v4 }
  0x89   :  { %68 = vst.msk [vmem:[#allocation2] sm:$0xff] %vm19_vm0, %v65_v6 }
  0x8e   :  { %v62_v9 = vpop.f32.mrf.mxu0 }
  0x8f   :  { %v66_v10 = vadd.f32 %v62_v9, %v23_v7 }
  0x90   :  { %v73_v11 = vld [vmem:[#allocation2] sm:$0xff] }
  0x91   :  { %v235_v12 = vadd.f32 %v194_v8, %v73_v11  ;;  %69 = vst.msk [vmem:[#allocation2 + $0x8] sm:$0xff] %vm19_vm0, %v66_v10 }
  0x93   :  { %v83_v13 = vmul.f32 0.70710677, %v235_v12 }
  0x95   :  { %v85_v14 = vmul.f32 %v83_v13, %v83_v13 }
  0x97   :  { %v86_v15 = vmin.f32 %v85_v14, 16.0 }
  0x98   :  { %v74_v16 = vld [vmem:[#allocation2 + $0x8] sm:$0xff] }
  0x99   :  { %v87_v17 = vmul.f32 2.1237322e-06, %v86_v15  ;;  %v98_v18 = vmul.f32 3.8918573e-05, %v86_v15  ;;  %v239_v19 = vadd.f32 %v194_v8, %v74_v16 }
  0x9b   :  { %v88_v20 = vadd.f32 0.00028619796, %v87_v17  ;;  %v99_v21 = vadd.f32 0.001143296, %v98_v18  ;;  %v242_v22 = vmul.f32 0.70710677, %v239_v19 }
  0x9c   :  { %v81_v18 = vmul.f32 0.5, %v235_v12  ;;  %v82_v12 = vmul.f32 0.5, %v239_v19 }
  0x9d   :  { %v89_v23 = vmul.f32 %v88_v20, %v86_v15  ;;  %v100_v24 = vmul.f32 %v99_v21, %v86_v15  ;;  %v125_v25 = vmul.f32 %v242_v22, %v242_v22 }
  0x9f   :  { %v101_v26 = vadd.f32 0.014752088, %v100_v24  ;;  %v90_v27 = vadd.f32 0.0036580483, %v89_v23  ;;  %v126_v28 = vmin.f32 %v125_v25, 16.0 }
  0xa1   :  { %v102_v29 = vmul.f32 %v101_v26, %v86_v15  ;;  %v127_v30 = vmul.f32 2.1237322e-06, %v126_v28  ;;  %v138_v31 = vmul.f32 3.8918573e-05, %v126_v28  ;;  %v91_v33 = vmul.f32 %v90_v27, %v86_v15 }
  0xa3   :  { %v103_v32 = vadd.f32 0.112945676, %v102_v29  ;;  %v128_v34 = vadd.f32 0.00028619796, %v127_v30  ;;  %v139_v35 = vadd.f32 0.001143296, %v138_v31 }
  0xa4   :  { %v92_v40 = vadd.f32 0.05243302, %v91_v33 }
  0xa5   :  { %v104_v36 = vmul.f32 %v103_v32, %v86_v15  ;;  %v129_v37 = vmul.f32 %v128_v34, %v126_v28  ;;  %v140_v38 = vmul.f32 %v139_v35, %v126_v28 }
  0xa6   :  { %v93_v46 = vmul.f32 %v92_v40, %v86_v15 }
  0xa7   :  { %v105_v39 = vadd.f32 0.4994258, %v104_v36  ;;  %v141_v41 = vadd.f32 0.014752088, %v140_v38  ;;  %v130_v43 = vadd.f32 0.0036580483, %v129_v37 }
  0xa8   :  { %v94_v50 = vadd.f32 0.18741608, %v93_v46 }
  0xa9   :  { %v106_v42 = vmul.f32 %v105_v39, %v86_v15  ;;  %v142_v44 = vmul.f32 %v141_v41, %v126_v28  ;;  %v131_v48 = vmul.f32 %v130_v43, %v126_v28 }
  0xaa   :  { %v95_v55 = vmul.f32 %v94_v50, %v86_v15 }
  0xab   :  { %v107_v45 = vadd.f32 1.0, %v106_v42  ;;  %v143_v47 = vadd.f32 0.112945676, %v142_v44  ;;  %v132_v52 = vadd.f32 0.05243302, %v131_v48 }
  0xac   :  { %v96_v61 = vadd.f32 1.1283791, %v95_v55 }
  0xad   :  { %195 = vrcp.f32 %v107_v45  ;;  %v144_v49 = vmul.f32 %v143_v47, %v126_v28  ;;  %v133_v58 = vmul.f32 %v132_v52, %v126_v28  ;;  %v119_v60 = vand.u32 2147483648, %v107_v45 }
  0xae   :  { %v117_v63 = vand.u32 2147483647, %v107_v45  ;;  %vm113_vm3 = vweird.f32 %v107_v45  ;;  %v97_v4 = vmul.f32 %v96_v61, %v83_v13 }
  0xaf   :  { %v145_v51 = vadd.f32 0.4994258, %v144_v49  ;;  %v134_v0 = vadd.f32 0.18741608, %v133_v58  ;;  %v120_v2 = vor.u32 1.1754944e-38, %v119_v60 }
  0xb0   :  { %vm118_vm5 = vcmp.eq.f32.partialorder %v117_v63, 8.507059e+37 }
  0xb1   :  { %v146_v53 = vmul.f32 %v145_v51, %v126_v28  ;;  %v135_v7 = vmul.f32 %v134_v0, %v126_v28 }
  0xb3   :  { %v196_v54 = vpop.eup %195  ;;  %v147_v57 = vadd.f32 1.0, %v146_v53  ;;  %v136_v15 = vadd.f32 1.1283791, %v135_v7 }
  0xb4   :  { %v109_v56 = vmul.f32 %v196_v54, %v107_v45  ;;  %vm114_vm2 = vweird.f32 %v196_v54 }
  0xb5   :  { %197 = vrcp.f32 %v147_v57  ;;  %vm115_vm4 = vmor %vm113_vm3, %vm114_vm2  ;;  %v159_v14 = vand.u32 2147483648, %v147_v57  ;;  %v157_v17 = vand.u32 2147483647, %v147_v57  ;;  %vm153_vm7 = vweird.f32 %v147_v57 }
  0xb6   :  { %v110_v59 = vsub.f32 1.0, %v109_v56  ;;  %v137_v24 = vmul.f32 %v136_v15, %v242_v22 }
  0xb7   :  { %v160_v13 = vor.u32 1.1754944e-38, %v159_v14  ;;  %vm158_vm9 = vcmp.eq.f32.partialorder %v157_v17, 8.507059e+37 }
  0xb8   :  { %v111_v62 = vmul.f32 %v196_v54, %v110_v59 }
  0xba   :  { %v112_v1 = vadd.f32 %v196_v54, %v111_v62 }
  0xbb   :  { %v198_v3 = vpop.eup %197 }
  0xbc   :  { %v116_v5 = vsel %vm115_vm4, %v196_v54, %v112_v1  ;;  %v149_v8 = vmul.f32 %v198_v3, %v147_v57  ;;  %vm154_vm6 = vweird.f32 %v198_v3 }
  0xbd   :  { %v121_v6 = vsel %vm118_vm5, %v120_v2, %v116_v5  ;;  %vm155_vm8 = vmor %vm153_vm7, %vm154_vm6 }
  0xbe   :  { %v122_v9 = vmul.f32 %v121_v6, %v97_v4  ;;  %v150_v10 = vsub.f32 1.0, %v149_v8 }
  0xc0   :  { %v188_v11 = vclamps-f32 %v122_v9, 1.0  ;;  %v151_v16 = vmul.f32 %v198_v3, %v150_v10 }
  0xc2   :  { %v165_v20 = vadd.f32 1.0, %v188_v11  ;;  %v152_v21 = vadd.f32 %v198_v3, %v151_v16 }
  0xc4   :  { %v167_v23 = vmul.f32 %v165_v20, %v81_v18  ;;  %v156_v25 = vsel %vm155_vm8, %v198_v3, %v152_v21 }
  0xc5   :  { %v161_v26 = vsel %vm158_vm9, %v160_v13, %v156_v25 }
  0xc6   :  { %169 = vst.msk [vmem:[%s260_s3] sm:$0xff] %vm19_vm0, %v167_v23  ;;  %v162_v27 = vmul.f32 %v161_v26, %v137_v24 }
  0xc8   :  { %v189_v28 = vclamps-f32 %v162_v27, 1.0 }
  0xca   :  { %v166_v29 = vadd.f32 1.0, %v189_v28 }
  0xcc   :  { %v168_v30 = vmul.f32 %v166_v29, %v82_v12 }
  0xce   :  { %170 = vst.msk [vmem:[%s260_s3 + $0x8] sm:$0xff] %vm19_vm0, %v168_v30 }

// kernel: bert_classifier_forward.22
= control target key start
LH: loop header
LB: loop body
LE: loop exit
PB: predicated region body
PF: predicated region fallthrough
CT: control target
= control target key end

     0   :  { %vm19_vm0 = vcmask 261120   ;;  %v131_v1 = vmov 0.0   ;;  %vm63_vm1 = vcmask 523264   ;;  %s182_s1 = inlined_call_operand.vmem [shape: bf16[64,32], index: 1, kind: input, shape index: {}]   ;;  %s183_s2 = inlined_call_operand.vmem [shape: f32[1,32], index: 2, kind: input, shape index: {}]   ;;  %s184_s0 = inlined_call_operand.vmem [shape: bf16[16,64], index: 0, kind: input, shape index: {}]   ;;  %s185_s3 = inlined_call_operand.vmem [shape: f32[16,32], index: 3, kind: output, shape index: {}]  }
   0x1   :  { %v128_v0 = vld [vmem:[%s182_s1 + $0x18] sm:$0xff]  ;;  %20 = vst.msk [vmem:[#allocation2] sm:$0xff] %vm19_vm0, %v131_v1  ;;  %v127_v2 = vld [vmem:[%s182_s1 + $0x10] sm:$0xff]  ;;  %v126_v3 = vld [vmem:[%s182_s1 + $0x8] sm:$0xff] }
   0x2   :  { %21 = vst.msk [vmem:[#allocation2 + $0x8] sm:$0xff] %vm19_vm0, %v131_v1  ;;  %71 = vmatpush.bf16.msra.mxu0 %v128_v0  ;;  %v125_v4 = vld [vmem:[%s182_s1] sm:$0xff] }
   0x3   :  { %v124_v5 = vld [vmem:[%s184_s0] sm:$0xff] }
   0x4   :  { %v130_v10 = vld [vmem:[%s183_s2] ss:$0 sm:$0xff] }
   0x6   :  { %72 = vmatpush.bf16.msra.mxu0 %v127_v2 }
   0x8   :  { %v22_v6 = vld [vmem:[#allocation2] sm:$0xff] }
   0x9   :  { %v23_v9 = vld [vmem:[#allocation2 + $0x8] sm:$0xff] }
   0xa   :  { %73 = vmatpush.bf16.msra.mxu0 %v126_v3 }
   0xe   :  { %74 = vmatpush.bf16.msra.mxu0 %v125_v4 }
  0x11   :  { %123 = vmatmul.msk.bf16.vlgmr.msra.gmra.mxu0 %vm63_vm1, %v124_v5 }
  0x8e   :  { %v76_v7 = vpop.f32.mrf.mxu0 }
  0x8f   :  { %v81_v8 = vadd.f32 %v76_v7, %v22_v6 }
  0x91   :  { %84 = vst.msk [vmem:[#allocation2] sm:$0xff] %vm19_vm0, %v81_v8 }
  0x96   :  { %v78_v11 = vpop.f32.mrf.mxu0 }
  0x97   :  { %v82_v12 = vadd.f32 %v78_v11, %v23_v9 }
  0x98   :  { %v89_v13 = vld [vmem:[#allocation2] sm:$0xff] }
  0x99   :  { %v95_v14 = vadd.f32 %v130_v10, %v89_v13  ;;  %85 = vst.msk [vmem:[#allocation2 + $0x8] sm:$0xff] %vm19_vm0, %v82_v12 }
  0x9b   :  { %97 = vst.msk [vmem:[%s185_s3] sm:$0xff] %vm19_vm0, %v95_v14 }
  0xa0   :  { %v90_v15 = vld [vmem:[#allocation2 + $0x8] sm:$0xff] }
  0xa1   :  { %v96_v16 = vadd.f32 %v130_v10, %v90_v15 }
  0xa3   :  { %98 = vst.msk [vmem:[%s185_s3 + $0x8] sm:$0xff] %vm19_vm0, %v96_v16 }

// kernel: bert_classifier_forward.31
= control target key start
LH: loop header
LB: loop body
LE: loop exit
PB: predicated region body
PF: predicated region fallthrough
CT: control target
= control target key end

     0   :  { %vm38_vm0 = vcmask 261120   ;;  %s118_s1 = inlined_call_operand.vmem [shape: bf16[32,128], index: 1, kind: input, shape index: {}]   ;;  %s119_s2 = inlined_call_operand.vmem [shape: f32[1,128], index: 2, kind: input, shape index: {}]   ;;  %s120_s0 = inlined_call_operand.vmem [shape: bf16[8,32], index: 0, kind: input, shape index: {}]   ;;  %s121_s3 = inlined_call_operand.vmem [shape: f32[8,128], index: 3, kind: output, shape index: {}]  }
   0x1   :  { %v81_v0 = vld [vmem:[%s118_s1 + $0x8] sm:$0xff]  ;;  %v80_v1 = vld [vmem:[%s118_s1] sm:$0xff] }
   0x2   :  { %48 = vmatpush.bf16.msra.mxu0 %v81_v0  ;;  %v21_v2 = vld [vmem:[%s120_s0] sm:$0xf] }
   0x3   :  { %v82_v3 = vld [vmem:[%s119_s2] ss:$0 sm:$0xff] }
   0x6   :  { %49 = vmatpush.bf16.msra.mxu0 %v80_v1 }
   0x9   :  { %79 = vmatmul.msk.bf16.vlgmr.msra.gmra.mxu0 %vm38_vm0, %v21_v2 }
  0x86   :  { %v51_v4 = vpop.f32.mrf.mxu0 }
  0x87   :  { %v65_v5 = vadd.f32 %v82_v3, %v51_v4 }
  0x89   :  { %66 = vst [vmem:[%s121_s3] sm:$0xff] %v65_v5 }
  0x8e   :  { %v53_v6 = vpop.f32.mrf.mxu0 }

</bundles_post_ra>
